<compile_context>
chip_gen: v7x
topology: tpu7x:2x2x1
jax: 0.10.0
libtpu: 0.0.40
codegen_flags: <defaults>
</compile_context>

<pallas_src>
import functools

import numpy as np
import jax
import jax.numpy as jnp
from jax import lax
from jax.experimental import pallas as pl
from jax.experimental.pallas import tpu as pltpu

_BN_EPS = 1e-5
_NEG = float("-inf")   # max-pool padding value (PyTorch pads max-pool windows with -inf)

# 5x5 tap offsets (dy, dx) in row-major order; the kernel's im2col row blocks and the
# wrapper's stacked weight rows both follow this order.
_TAPS = [(dy, dx) for dy in range(-2, 3) for dx in range(-2, 3)]


# --------------------------------- the kernel --------------------------------

def _decoder_kernel(x_ref, wbt_ref, ob_ref, wallt_ref, off_ref, out_ref,
                    bnpad_ref, patches_ref, poolpad_ref, *, width):
    C, HW = x_ref.shape
    cbn = wbt_ref.shape[0]
    W = width
    f32 = jnp.float32
    mmdt = wbt_ref.dtype                         # MXU operand dtype (bf16 by default)

    x = x_ref[...]                               # (C, HW) f32; H*W on lanes (lane-dense)

    # lane -> w coordinate, used to mask horizontal wrap-around of flat lane shifts
    w_of_lane = lax.broadcasted_iota(jnp.int32, (1, HW), 1) % W

    # ---- bottleneck: 1x1 conv (BN scale folded) + offset + ReLU, one MXU matmul ----
    bn = jnp.dot(wbt_ref[...], x.astype(mmdt), preferred_element_type=f32)
    bn = jnp.maximum(bn + ob_ref[...], 0.0)      # (cbn, HW) f32

    # ---- zero-padded flat staging of bn -------------------------------------------
    # Flat spatial index j = h*W + w, so a (dy, dx) spatial shift is a lane shift by
    # s = dy*W + dx.  Vertical out-of-bounds lands in the zero pad automatically;
    # horizontal wrap-around across row boundaries is masked with `w_of_lane`.
    PB = 2 * W + 2                               # covers |s| <= 2*W + 2 exactly
    bnpad_ref[:, 0:PB] = jnp.zeros((cbn, PB), f32)
    bnpad_ref[:, PB + HW:PB + HW + PB] = jnp.zeros((cbn, PB), f32)
    bnpad_ref[:, PB:PB + HW] = bn

    # ---- im2col: 25 shifted lane-slices -> (25*cbn, HW) patch matrix ---------------
    valid_for_dx = {dx: (w_of_lane + dx >= 0) & (w_of_lane + dx <= W - 1)
                    for dx in (-2, -1, 1, 2)}
    for t, (dy, dx) in enumerate(_TAPS):
        s = dy * W + dx
        shifted = bnpad_ref[:, PB + s:PB + s + HW]            # (cbn, HW)
        if dx:
            shifted = jnp.where(valid_for_dx[dx], shifted, 0.0)
        patches_ref[t * cbn:(t + 1) * cbn, :] = shifted

    # ---- conv1 + conv3 + conv5 in ONE wide MXU matmul ------------------------------
    # wallt is (3C, 25*cbn): rows [0,C)=conv1, [C,2C)=conv3, [2C,3C)=conv5, with BN
    # scale already folded into the weights and zeros on the taps a branch doesn't use.
    y = jnp.dot(wallt_ref[...], patches_ref[...].astype(mmdt),
                preferred_element_type=f32)
    y = jnp.maximum(y + off_ref[...], 0.0)                    # (3C, HW)
    branches = y[0:C, :] + y[C:2 * C, :] + y[2 * C:3 * C, :]

    # ---- 3x3 stride-1 max-pool, separable: row max then column max -----------------
    PP = W                                        # covers the +-W vertical lane shift
    poolpad_ref[:, 0:PP] = jnp.full((C, PP), _NEG, f32)
    poolpad_ref[:, PP + HW:PP + HW + PP] = jnp.full((C, PP), _NEG, f32)
    poolpad_ref[:, PP:PP + HW] = x
    left = jnp.where(w_of_lane >= 1, poolpad_ref[:, PP - 1:PP - 1 + HW], _NEG)
    right = jnp.where(w_of_lane <= W - 2, poolpad_ref[:, PP + 1:PP + 1 + HW], _NEG)
    rowmax = jnp.maximum(jnp.maximum(left, x), right)
    poolpad_ref[:, PP:PP + HW] = rowmax           # reuse the buffer for the vertical pass
    pool = jnp.maximum(jnp.maximum(poolpad_ref[:, 0:HW], rowmax),
                       poolpad_ref[:, PP + W:PP + W + HW])

    out_ref[...] = branches + pool


# ------------------------------ parameter glue --------------------------------

def init_params(key, chs):
    """Deterministic synthetic parameters (shapes follow the PyTorch __init__)."""
    bn_ch = chs // 2
    specs = {
        "bottleneck": (chs, bn_ch, 1),
        "conv1": (bn_ch, chs, 1),
        "conv3": (bn_ch, chs, 3),
        "conv5": (bn_ch, chs, 5),
    }
    params = {}
    for name, (cin, cout, k) in specs.items():
        key, kw, kb, kg, kbeta, km, kv = jax.random.split(key, 7)
        params[name] = dict(
            weight=0.3 * jax.random.normal(kw, (cin, cout, k, k), jnp.float32),
            bias=0.1 * jax.random.normal(kb, (cout,), jnp.float32),
            gamma=1.0 + 0.1 * jax.random.normal(kg, (cout,), jnp.float32),
            beta=0.05 * jax.random.normal(kbeta, (cout,), jnp.float32),
            mean=0.1 * jax.random.normal(km, (cout,), jnp.float32),
            var=0.5 + 0.5 * jax.random.uniform(kv, (cout,), jnp.float32),
        )
    return params


def _deconv_weight_to_conv(wt):
    """ConvTranspose2d weight (Cin, Cout, k, k) -> 'same'-conv weight (k, k, Cin, Cout)."""
    return jnp.transpose(jnp.flip(wt, axis=(2, 3)), (2, 3, 0, 1))


def _fold_branch(p):
    """Fold eval-mode BN (and the conv bias) into the conv weight + per-channel offset.

    The fold is done entirely in f32 (exact); any bf16 cast happens afterwards.
    """
    scale = p["gamma"] / jnp.sqrt(p["var"] + _BN_EPS)              # (Cout,)
    offset = (p["bias"] - p["mean"]) * scale + p["beta"]           # (Cout,)
    w = _deconv_weight_to_conv(p["weight"]) * scale[None, None, None, :]
    return w.astype(jnp.float32), offset.astype(jnp.float32)


# --------------------------------- wrapper ------------------------------------

def decoder_forward(x_nchw, params, *, matmul_dtype=jnp.bfloat16):
    """Forward pass of DecoderModule (eval-mode BatchNorm folded into the weights).

    matmul_dtype: dtype of the MXU operands (weights + activation casts at the dots).
    bfloat16 (default) is single-pass MXU-native on v5e/v6e/v7x; float32 operands use
    DEFAULT precision (also a single bf16 pass) — accumulation and all BN/ReLU/max-pool
    math stay float32 either way.
    """
    N, C, H, W = x_nchw.shape
    cbn = C // 2
    HW = H * W

    # Free reshape (contiguous NCHW): no transpose, no extra HBM traffic.
    x2 = x_nchw.reshape(N, C, HW).astype(jnp.float32)

    wb, ob = _fold_branch(params["bottleneck"])            # (1,1,C,cbn), (cbn,)
    w1, o1 = _fold_branch(params["conv1"])                 # (1,1,cbn,C), (C,)
    w3, o3 = _fold_branch(params["conv3"])                 # (3,3,cbn,C), (C,)
    w5, o5 = _fold_branch(params["conv5"])                 # (5,5,cbn,C), (C,)

    wbt = jnp.transpose(wb[0, 0]).astype(matmul_dtype)     # (cbn, C)
    ob_col = ob.reshape(cbn, 1)

    # Stack conv1/conv3/conv5 along the output axis into one (3C, 25*cbn) matrix whose
    # K axis is ordered (tap-major, bottleneck-channel-minor) to match the kernel's
    # im2col buffer; taps a branch doesn't use are zero.  Scale folded in f32 above.
    w1p = jnp.zeros((5, 5, cbn, C), jnp.float32).at[2, 2].set(w1[0, 0])
    w3p = jnp.pad(w3, ((1, 1), (1, 1), (0, 0), (0, 0)))
    w_all = jnp.concatenate([w1p, w3p, w5], axis=-1)                    # (5,5,cbn,3C)
    wallt = jnp.transpose(w_all.reshape(25 * cbn, 3 * C)).astype(matmul_dtype)
    off_all = jnp.concatenate([o1, o3, o5]).reshape(3 * C, 1)

    def const_spec(a):
        return pl.BlockSpec(a.shape, lambda b, _n=a.ndim: (0,) * _n)

    grid_spec = pltpu.PrefetchScalarGridSpec(
        num_scalar_prefetch=0,
        grid=(N,),                        # >= 2 parallel steps -> both v7x TensorCores
        in_specs=[
            pl.BlockSpec((None, C, HW), lambda b: (b, 0, 0)),
            const_spec(wbt), const_spec(ob_col),
            const_spec(wallt), const_spec(off_all),
        ],
        out_specs=pl.BlockSpec((None, C, HW), lambda b: (b, 0, 0)),
        scratch_shapes=[
            pltpu.VMEM((cbn, HW + 2 * (2 * W + 2)), jnp.float32),   # zero-padded bn
            pltpu.VMEM((25 * cbn, HW), jnp.float32),                # im2col patches
            pltpu.VMEM((C, HW + 2 * W), jnp.float32),               # -inf-padded pool buf
        ],
    )

    weights = (wbt, ob_col, wallt, off_all)
    w_bytes = sum(int(np.prod(a.shape)) * a.dtype.itemsize for a in weights)
    flops = int(N * (2 * HW * C * cbn + 2 * HW * (25 * cbn) * (3 * C) + 9 * HW * C))
    bytes_accessed = int(2 * N * C * HW * 4 + w_bytes)

    out2 = pl.pallas_call(
        functools.partial(_decoder_kernel, width=W),
        out_shape=jax.ShapeDtypeStruct((N, C, HW), jnp.float32),
        grid_spec=grid_spec,
        compiler_params=pltpu.CompilerParams(
            dimension_semantics=("parallel",),
        ),
        cost_estimate=pl.CostEstimate(flops=flops, transcendentals=0,
                                      bytes_accessed=bytes_accessed),
    )(x2, wbt, ob_col, wallt, off_all)

    return out2.reshape(N, C, H, W)                         # free reshape back to NCHW


# ---------------------------- pure-JAX reference -------------------------------

def decoder_reference(x_nchw, params):
    def conv_bn_relu(x, p, k):
        # transposed conv (stride 1, pad (k-1)//2) == same conv with flipped kernel
        w = jnp.transpose(jnp.flip(p["weight"], axis=(2, 3)), (1, 0, 2, 3))  # (O, I, k, k)
        pad = (k - 1) // 2
        y = lax.conv_general_dilated(x, w, (1, 1), [(pad, pad), (pad, pad)],
                                     dimension_numbers=("NCHW", "OIHW", "NCHW"),
                                     precision=lax.Precision.HIGHEST)
        y = y + p["bias"][None, :, None, None]
        y = (y - p["mean"][None, :, None, None]) / jnp.sqrt(
            p["var"][None, :, None, None] + _BN_EPS)
        y = y * p["gamma"][None, :, None, None] + p["beta"][None, :, None, None]
        return jnp.maximum(y, 0.0)

    bn = conv_bn_relu(x_nchw, params["bottleneck"], 1)
    c1 = conv_bn_relu(bn, params["conv1"], 1)
    c3 = conv_bn_relu(bn, params["conv3"], 3)
    c5 = conv_bn_relu(bn, params["conv5"], 5)
    pool = lax.reduce_window(x_nchw, -jnp.inf, lax.max,
                             (1, 1, 3, 3), (1, 1, 1, 1),
                             ((0, 0), (0, 0), (1, 1), (1, 1)))
    return c1 + c3 + c5 + pool


if __name__ == "__main__":
    key = jax.random.PRNGKey(0)
    kx, kp = jax.random.split(key)

    N, CHS, H, W = 2, 4, 16, 16
    x = jax.random.normal(kx, (N, CHS, H, W), jnp.float32)
    params = init_params(kp, CHS)

    out = jax.block_until_ready(decoder_forward(x, params))
    assert out.shape == (N, CHS, H, W)

    ref = decoder_reference(x, params)
    # Tolerance sized for the bf16 MXU production path (50-deep contractions, O(1-3)
    # outputs): bf16 rounding gives ~1e-2 worst-case deviations, structural bugs give
    # O(0.1-1) and are still caught.
    if not jnp.allclose(out, ref, atol=5e-2, rtol=5e-2):
        max_err = float(jnp.max(jnp.abs(out - ref)))
        raise AssertionError(f"mismatch vs reference, max abs err = {max_err}")

    print("KERNEL_OK")
</pallas_src>

<mosaic_0001>
module attributes {stable_mosaic.version = 11 : i64} {
  func.func @_decoder_kernel(%arg0: i32, %arg1: memref<1x4x256xf32, #tpu.memory_space<vmem>>, %arg2: memref<2x4xbf16, #tpu.memory_space<vmem>>, %arg3: memref<2x1xf32, #tpu.memory_space<vmem>>, %arg4: memref<12x50xbf16, #tpu.memory_space<vmem>>, %arg5: memref<12x1xf32, #tpu.memory_space<vmem>>, %arg6: memref<1x4x256xf32, #tpu.memory_space<vmem>>, %arg7: memref<2x324xf32, #tpu.memory_space<vmem>>, %arg8: memref<50x256xf32, #tpu.memory_space<vmem>>, %arg9: memref<4x288xf32, #tpu.memory_space<vmem>>) attributes {dimension_semantics = [#tpu.dimension_semantics<parallel>], iteration_bounds = array<i64: 2>, scalar_prefetch = 0 : i64, scratch_operands = 3 : i64, tpu.core_type = #tpu.core_type<tc>, window_params = [{transform_indices = @transform_0, window_bounds = array<i64: 1, 4, 256>}, {pipeline_mode = #tpu.pipeline_mode<synchronous>, transform_indices = @transform_1, window_bounds = array<i64: 2, 4>}, {pipeline_mode = #tpu.pipeline_mode<synchronous>, transform_indices = @transform_2, window_bounds = array<i64: 2, 1>}, {pipeline_mode = #tpu.pipeline_mode<synchronous>, transform_indices = @transform_3, window_bounds = array<i64: 12, 50>}, {pipeline_mode = #tpu.pipeline_mode<synchronous>, transform_indices = @transform_4, window_bounds = array<i64: 12, 1>}, {transform_indices = @transform_5, window_bounds = array<i64: 1, 4, 256>}]} {
    %c0 = arith.constant 0 : index
    %c0_0 = arith.constant 0 : index
    %c0_1 = arith.constant 0 : index
    %0 = vector.load %arg1[%c0, %c0_0, %c0_1] : memref<1x4x256xf32, #tpu.memory_space<vmem>>, vector<1x4x256xf32>
    %1 = vector.shape_cast %0 : vector<1x4x256xf32> to vector<4x256xf32>
    %2 = tpu.iota {dimensions = array<i32: 1>} : vector<1x256xi32>
    %c16_i32 = arith.constant 16 : i32
    %c0_i32 = arith.constant 0 : i32
    %3 = arith.cmpi eq, %c16_i32, %c0_i32 : i32
    %c1_i32 = arith.constant 1 : i32
    %4 = arith.select %3, %c1_i32, %c16_i32 : i32
    %5 = vector.broadcast %4 : i32 to vector<1x256xi32>
    %6 = arith.remsi %2, %5 : vector<1x256xi32>
    %c0_i32_2 = arith.constant 0 : i32
    %7 = vector.broadcast %c0_i32_2 : i32 to vector<1x256xi32>
    %8 = arith.cmpi ne, %6, %7 : vector<1x256xi32>
    %c0_i32_3 = arith.constant 0 : i32
    %9 = vector.broadcast %c0_i32_3 : i32 to vector<1x256xi32>
    %10 = arith.cmpi slt, %6, %9 : vector<1x256xi32>
    %c0_i32_4 = arith.constant 0 : i32
    %11 = arith.cmpi slt, %4, %c0_i32_4 : i32
    %12 = vector.broadcast %11 : i1 to vector<1x256xi1>
    %13 = vector.broadcast %12 : vector<1x256xi1> to vector<1x256xi1>
    %14 = arith.xori %10, %13 : vector<1x256xi1>
    %15 = arith.andi %14, %8 : vector<1x256xi1>
    %16 = vector.broadcast %4 : i32 to vector<1x256xi32>
    %17 = arith.addi %6, %16 : vector<1x256xi32>
    %18 = arith.select %15, %17, %6 : vector<1x256xi1>, vector<1x256xi32>
    %c0_5 = arith.constant 0 : index
    %c0_6 = arith.constant 0 : index
    %19 = vector.load %arg2[%c0_5, %c0_6] : memref<2x4xbf16, #tpu.memory_space<vmem>>, vector<2x4xbf16>
    %20 = arith.truncf %1 : vector<4x256xf32> to vector<4x256xbf16>
    %cst = arith.constant dense<0.000000e+00> : vector<2x256xf32>
    %21 = tpu.matmul %19, %20, %cst {dimension_numbers = #tpu.dot_dimension_numbers<[1], [0], [0], [1], [0, 0, 1, 1], [], []>} : vector<2x4xbf16>, vector<4x256xbf16>, vector<2x256xf32> -> vector<2x256xf32>
    %c0_7 = arith.constant 0 : index
    %c0_8 = arith.constant 0 : index
    %22 = vector.load %arg3[%c0_7, %c0_8] : memref<2x1xf32, #tpu.memory_space<vmem>>, vector<2x1xf32>
    %23 = vector.broadcast %22 : vector<2x1xf32> to vector<2x256xf32>
    %24 = arith.addf %21, %23 : vector<2x256xf32>
    %cst_9 = arith.constant 0.000000e+00 : f32
    %25 = vector.broadcast %cst_9 : f32 to vector<2x256xf32>
    %26 = arith.maximumf %24, %25 : vector<2x256xf32>
    %cst_10 = arith.constant 0.000000e+00 : f32
    %27 = vector.broadcast %cst_10 : f32 to vector<2x34xf32>
    %c0_11 = arith.constant 0 : index
    %c0_12 = arith.constant 0 : index
    %28 = vector.load %arg7[%c0_11, %c0_12] : memref<2x324xf32, #tpu.memory_space<vmem>>, vector<2x34xf32>
    tpu.vector_store %arg7[%c0_11, %c0_12], %27 {strides = array<i32>} : memref<2x324xf32, #tpu.memory_space<vmem>>, vector<2x34xf32>,
    %cst_13 = arith.constant 0.000000e+00 : f32
    %29 = vector.broadcast %cst_13 : f32 to vector<2x34xf32>
    %c0_14 = arith.constant 0 : index
    %c290 = arith.constant 290 : index
    %30 = vector.load %arg7[%c0_14, %c290] : memref<2x324xf32, #tpu.memory_space<vmem>>, vector<2x34xf32>
    tpu.vector_store %arg7[%c0_14, %c290], %29 {strides = array<i32>} : memref<2x324xf32, #tpu.memory_space<vmem>>, vector<2x34xf32>,
    %c0_15 = arith.constant 0 : index
    %c34 = arith.constant 34 : index
    %31 = vector.load %arg7[%c0_15, %c34] : memref<2x324xf32, #tpu.memory_space<vmem>>, vector<2x256xf32>
    tpu.vector_store %arg7[%c0_15, %c34], %26 {strides = array<i32>} : memref<2x324xf32, #tpu.memory_space<vmem>>, vector<2x256xf32>,
    %c-2_i32 = arith.constant -2 : i32
    %32 = vector.broadcast %c-2_i32 : i32 to vector<1x256xi32>
    %33 = arith.addi %18, %32 : vector<1x256xi32>
    %c0_i32_16 = arith.constant 0 : i32
    %34 = vector.broadcast %c0_i32_16 : i32 to vector<1x256xi32>
    %35 = arith.cmpi sge, %33, %34 : vector<1x256xi32>
    %c-2_i32_17 = arith.constant -2 : i32
    %36 = vector.broadcast %c-2_i32_17 : i32 to vector<1x256xi32>
    %37 = arith.addi %18, %36 : vector<1x256xi32>
    %c15_i32 = arith.constant 15 : i32
    %38 = vector.broadcast %c15_i32 : i32 to vector<1x256xi32>
    %39 = arith.cmpi sle, %37, %38 : vector<1x256xi32>
    %40 = arith.andi %35, %39 : vector<1x256xi1>
    %c-1_i32 = arith.constant -1 : i32
    %41 = vector.broadcast %c-1_i32 : i32 to vector<1x256xi32>
    %42 = arith.addi %18, %41 : vector<1x256xi32>
    %c0_i32_18 = arith.constant 0 : i32
    %43 = vector.broadcast %c0_i32_18 : i32 to vector<1x256xi32>
    %44 = arith.cmpi sge, %42, %43 : vector<1x256xi32>
    %c-1_i32_19 = arith.constant -1 : i32
    %45 = vector.broadcast %c-1_i32_19 : i32 to vector<1x256xi32>
    %46 = arith.addi %18, %45 : vector<1x256xi32>
    %c15_i32_20 = arith.constant 15 : i32
    %47 = vector.broadcast %c15_i32_20 : i32 to vector<1x256xi32>
    %48 = arith.cmpi sle, %46, %47 : vector<1x256xi32>
    %49 = arith.andi %44, %48 : vector<1x256xi1>
    %c1_i32_21 = arith.constant 1 : i32
    %50 = vector.broadcast %c1_i32_21 : i32 to vector<1x256xi32>
    %51 = arith.addi %18, %50 : vector<1x256xi32>
    %c0_i32_22 = arith.constant 0 : i32
    %52 = vector.broadcast %c0_i32_22 : i32 to vector<1x256xi32>
    %53 = arith.cmpi sge, %51, %52 : vector<1x256xi32>
    %c1_i32_23 = arith.constant 1 : i32
    %54 = vector.broadcast %c1_i32_23 : i32 to vector<1x256xi32>
    %55 = arith.addi %18, %54 : vector<1x256xi32>
    %c15_i32_24 = arith.constant 15 : i32
    %56 = vector.broadcast %c15_i32_24 : i32 to vector<1x256xi32>
    %57 = arith.cmpi sle, %55, %56 : vector<1x256xi32>
    %58 = arith.andi %53, %57 : vector<1x256xi1>
    %c2_i32 = arith.constant 2 : i32
    %59 = vector.broadcast %c2_i32 : i32 to vector<1x256xi32>
    %60 = arith.addi %18, %59 : vector<1x256xi32>
    %c0_i32_25 = arith.constant 0 : i32
    %61 = vector.broadcast %c0_i32_25 : i32 to vector<1x256xi32>
    %62 = arith.cmpi sge, %60, %61 : vector<1x256xi32>
    %c2_i32_26 = arith.constant 2 : i32
    %63 = vector.broadcast %c2_i32_26 : i32 to vector<1x256xi32>
    %64 = arith.addi %18, %63 : vector<1x256xi32>
    %c15_i32_27 = arith.constant 15 : i32
    %65 = vector.broadcast %c15_i32_27 : i32 to vector<1x256xi32>
    %66 = arith.cmpi sle, %64, %65 : vector<1x256xi32>
    %67 = arith.andi %62, %66 : vector<1x256xi1>
    %c0_28 = arith.constant 0 : index
    %c0_29 = arith.constant 0 : index
    %68 = vector.load %arg7[%c0_28, %c0_29] : memref<2x324xf32, #tpu.memory_space<vmem>>, vector<2x256xf32>
    %cst_30 = arith.constant 0.000000e+00 : f32
    %69 = vector.shape_cast %40 : vector<1x256xi1> to vector<1x256xi1>
    %70 = vector.broadcast %69 : vector<1x256xi1> to vector<2x256xi1>
    %71 = vector.broadcast %cst_30 : f32 to vector<2x256xf32>
    %72 = arith.select %70, %68, %71 : vector<2x256xi1>, vector<2x256xf32>
    %c0_31 = arith.constant 0 : index
    %c0_32 = arith.constant 0 : index
    %73 = vector.load %arg8[%c0_31, %c0_32] : memref<50x256xf32, #tpu.memory_space<vmem>>, vector<2x256xf32>
    tpu.vector_store %arg8[%c0_31, %c0_32], %72 {strides = array<i32>} : memref<50x256xf32, #tpu.memory_space<vmem>>, vector<2x256xf32>,
    %c0_33 = arith.constant 0 : index
    %c1 = arith.constant 1 : index
    %74 = vector.load %arg7[%c0_33, %c1] : memref<2x324xf32, #tpu.memory_space<vmem>>, vector<2x256xf32>
    %cst_34 = arith.constant 0.000000e+00 : f32
    %75 = vector.shape_cast %49 : vector<1x256xi1> to vector<1x256xi1>
    %76 = vector.broadcast %75 : vector<1x256xi1> to vector<2x256xi1>
    %77 = vector.broadcast %cst_34 : f32 to vector<2x256xf32>
    %78 = arith.select %76, %74, %77 : vector<2x256xi1>, vector<2x256xf32>
    %c2 = arith.constant 2 : index
    %c0_35 = arith.constant 0 : index
    %79 = vector.load %arg8[%c2, %c0_35] : memref<50x256xf32, #tpu.memory_space<vmem>>, vector<2x256xf32>
    tpu.vector_store %arg8[%c2, %c0_35], %78 {strides = array<i32>} : memref<50x256xf32, #tpu.memory_space<vmem>>, vector<2x256xf32>,
    %c0_36 = arith.constant 0 : index
    %c2_37 = arith.constant 2 : index
    %80 = vector.load %arg7[%c0_36, %c2_37] : memref<2x324xf32, #tpu.memory_space<vmem>>, vector<2x256xf32>
    %c4 = arith.constant 4 : index
    %c0_38 = arith.constant 0 : index
    %81 = vector.load %arg8[%c4, %c0_38] : memref<50x256xf32, #tpu.memory_space<vmem>>, vector<2x256xf32>
    tpu.vector_store %arg8[%c4, %c0_38], %80 {strides = array<i32>} : memref<50x256xf32, #tpu.memory_space<vmem>>, vector<2x256xf32>,
    %c0_39 = arith.constant 0 : index
    %c3 = arith.constant 3 : index
    %82 = vector.load %arg7[%c0_39, %c3] : memref<2x324xf32, #tpu.memory_space<vmem>>, vector<2x256xf32>
    %cst_40 = arith.constant 0.000000e+00 : f32
    %83 = vector.shape_cast %58 : vector<1x256xi1> to vector<1x256xi1>
    %84 = vector.broadcast %83 : vector<1x256xi1> to vector<2x256xi1>
    %85 = vector.broadcast %cst_40 : f32 to vector<2x256xf32>
    %86 = arith.select %84, %82, %85 : vector<2x256xi1>, vector<2x256xf32>
    %c6 = arith.constant 6 : index
    %c0_41 = arith.constant 0 : index
    %87 = vector.load %arg8[%c6, %c0_41] : memref<50x256xf32, #tpu.memory_space<vmem>>, vector<2x256xf32>
    tpu.vector_store %arg8[%c6, %c0_41], %86 {strides = array<i32>} : memref<50x256xf32, #tpu.memory_space<vmem>>, vector<2x256xf32>,
    %c0_42 = arith.constant 0 : index
    %c4_43 = arith.constant 4 : index
    %88 = vector.load %arg7[%c0_42, %c4_43] : memref<2x324xf32, #tpu.memory_space<vmem>>, vector<2x256xf32>
    %cst_44 = arith.constant 0.000000e+00 : f32
    %89 = vector.shape_cast %67 : vector<1x256xi1> to vector<1x256xi1>
    %90 = vector.broadcast %89 : vector<1x256xi1> to vector<2x256xi1>
    %91 = vector.broadcast %cst_44 : f32 to vector<2x256xf32>
    %92 = arith.select %90, %88, %91 : vector<2x256xi1>, vector<2x256xf32>
    %c8 = arith.constant 8 : index
    %c0_45 = arith.constant 0 : index
    %93 = vector.load %arg8[%c8, %c0_45] : memref<50x256xf32, #tpu.memory_space<vmem>>, vector<2x256xf32>
    tpu.vector_store %arg8[%c8, %c0_45], %92 {strides = array<i32>} : memref<50x256xf32, #tpu.memory_space<vmem>>, vector<2x256xf32>,
    %c0_46 = arith.constant 0 : index
    %c16 = arith.constant 16 : index
    %94 = vector.load %arg7[%c0_46, %c16] : memref<2x324xf32, #tpu.memory_space<vmem>>, vector<2x256xf32>
    %cst_47 = arith.constant 0.000000e+00 : f32
    %95 = vector.shape_cast %40 : vector<1x256xi1> to vector<1x256xi1>
    %96 = vector.broadcast %95 : vector<1x256xi1> to vector<2x256xi1>
    %97 = vector.broadcast %cst_47 : f32 to vector<2x256xf32>
    %98 = arith.select %96, %94, %97 : vector<2x256xi1>, vector<2x256xf32>
    %c10 = arith.constant 10 : index
    %c0_48 = arith.constant 0 : index
    %99 = vector.load %arg8[%c10, %c0_48] : memref<50x256xf32, #tpu.memory_space<vmem>>, vector<2x256xf32>
    tpu.vector_store %arg8[%c10, %c0_48], %98 {strides = array<i32>} : memref<50x256xf32, #tpu.memory_space<vmem>>, vector<2x256xf32>,
    %c0_49 = arith.constant 0 : index
    %c17 = arith.constant 17 : index
    %100 = vector.load %arg7[%c0_49, %c17] : memref<2x324xf32, #tpu.memory_space<vmem>>, vector<2x256xf32>
    %cst_50 = arith.constant 0.000000e+00 : f32
    %101 = vector.shape_cast %49 : vector<1x256xi1> to vector<1x256xi1>
    %102 = vector.broadcast %101 : vector<1x256xi1> to vector<2x256xi1>
    %103 = vector.broadcast %cst_50 : f32 to vector<2x256xf32>
    %104 = arith.select %102, %100, %103 : vector<2x256xi1>, vector<2x256xf32>
    %c12 = arith.constant 12 : index
    %c0_51 = arith.constant 0 : index
    %105 = vector.load %arg8[%c12, %c0_51] : memref<50x256xf32, #tpu.memory_space<vmem>>, vector<2x256xf32>
    tpu.vector_store %arg8[%c12, %c0_51], %104 {strides = array<i32>} : memref<50x256xf32, #tpu.memory_space<vmem>>, vector<2x256xf32>,
    %c0_52 = arith.constant 0 : index
    %c18 = arith.constant 18 : index
    %106 = vector.load %arg7[%c0_52, %c18] : memref<2x324xf32, #tpu.memory_space<vmem>>, vector<2x256xf32>
    %c14 = arith.constant 14 : index
    %c0_53 = arith.constant 0 : index
    %107 = vector.load %arg8[%c14, %c0_53] : memref<50x256xf32, #tpu.memory_space<vmem>>, vector<2x256xf32>
    tpu.vector_store %arg8[%c14, %c0_53], %106 {strides = array<i32>} : memref<50x256xf32, #tpu.memory_space<vmem>>, vector<2x256xf32>,
    %c0_54 = arith.constant 0 : index
    %c19 = arith.constant 19 : index
    %108 = vector.load %arg7[%c0_54, %c19] : memref<2x324xf32, #tpu.memory_space<vmem>>, vector<2x256xf32>
    %cst_55 = arith.constant 0.000000e+00 : f32
    %109 = vector.shape_cast %58 : vector<1x256xi1> to vector<1x256xi1>
    %110 = vector.broadcast %109 : vector<1x256xi1> to vector<2x256xi1>
    %111 = vector.broadcast %cst_55 : f32 to vector<2x256xf32>
    %112 = arith.select %110, %108, %111 : vector<2x256xi1>, vector<2x256xf32>
    %c16_56 = arith.constant 16 : index
    %c0_57 = arith.constant 0 : index
    %113 = vector.load %arg8[%c16_56, %c0_57] : memref<50x256xf32, #tpu.memory_space<vmem>>, vector<2x256xf32>
    tpu.vector_store %arg8[%c16_56, %c0_57], %112 {strides = array<i32>} : memref<50x256xf32, #tpu.memory_space<vmem>>, vector<2x256xf32>,
    %c0_58 = arith.constant 0 : index
    %c20 = arith.constant 20 : index
    %114 = vector.load %arg7[%c0_58, %c20] : memref<2x324xf32, #tpu.memory_space<vmem>>, vector<2x256xf32>
    %cst_59 = arith.constant 0.000000e+00 : f32
    %115 = vector.shape_cast %67 : vector<1x256xi1> to vector<1x256xi1>
    %116 = vector.broadcast %115 : vector<1x256xi1> to vector<2x256xi1>
    %117 = vector.broadcast %cst_59 : f32 to vector<2x256xf32>
    %118 = arith.select %116, %114, %117 : vector<2x256xi1>, vector<2x256xf32>
    %c18_60 = arith.constant 18 : index
    %c0_61 = arith.constant 0 : index
    %119 = vector.load %arg8[%c18_60, %c0_61] : memref<50x256xf32, #tpu.memory_space<vmem>>, vector<2x256xf32>
    tpu.vector_store %arg8[%c18_60, %c0_61], %118 {strides = array<i32>} : memref<50x256xf32, #tpu.memory_space<vmem>>, vector<2x256xf32>,
    %c0_62 = arith.constant 0 : index
    %c32 = arith.constant 32 : index
    %120 = vector.load %arg7[%c0_62, %c32] : memref<2x324xf32, #tpu.memory_space<vmem>>, vector<2x256xf32>
    %cst_63 = arith.constant 0.000000e+00 : f32
    %121 = vector.shape_cast %40 : vector<1x256xi1> to vector<1x256xi1>
    %122 = vector.broadcast %121 : vector<1x256xi1> to vector<2x256xi1>
    %123 = vector.broadcast %cst_63 : f32 to vector<2x256xf32>
    %124 = arith.select %122, %120, %123 : vector<2x256xi1>, vector<2x256xf32>
    %c20_64 = arith.constant 20 : index
    %c0_65 = arith.constant 0 : index
    %125 = vector.load %arg8[%c20_64, %c0_65] : memref<50x256xf32, #tpu.memory_space<vmem>>, vector<2x256xf32>
    tpu.vector_store %arg8[%c20_64, %c0_65], %124 {strides = array<i32>} : memref<50x256xf32, #tpu.memory_space<vmem>>, vector<2x256xf32>,
    %c0_66 = arith.constant 0 : index
    %c33 = arith.constant 33 : index
    %126 = vector.load %arg7[%c0_66, %c33] : memref<2x324xf32, #tpu.memory_space<vmem>>, vector<2x256xf32>
    %cst_67 = arith.constant 0.000000e+00 : f32
    %127 = vector.shape_cast %49 : vector<1x256xi1> to vector<1x256xi1>
    %128 = vector.broadcast %127 : vector<1x256xi1> to vector<2x256xi1>
    %129 = vector.broadcast %cst_67 : f32 to vector<2x256xf32>
    %130 = arith.select %128, %126, %129 : vector<2x256xi1>, vector<2x256xf32>
    %c22 = arith.constant 22 : index
    %c0_68 = arith.constant 0 : index
    %131 = vector.load %arg8[%c22, %c0_68] : memref<50x256xf32, #tpu.memory_space<vmem>>, vector<2x256xf32>
    tpu.vector_store %arg8[%c22, %c0_68], %130 {strides = array<i32>} : memref<50x256xf32, #tpu.memory_space<vmem>>, vector<2x256xf32>,
    %c0_69 = arith.constant 0 : index
    %c34_70 = arith.constant 34 : index
    %132 = vector.load %arg7[%c0_69, %c34_70] : memref<2x324xf32, #tpu.memory_space<vmem>>, vector<2x256xf32>
    %c24 = arith.constant 24 : index
    %c0_71 = arith.constant 0 : index
    %133 = vector.load %arg8[%c24, %c0_71] : memref<50x256xf32, #tpu.memory_space<vmem>>, vector<2x256xf32>
    tpu.vector_store %arg8[%c24, %c0_71], %132 {strides = array<i32>} : memref<50x256xf32, #tpu.memory_space<vmem>>, vector<2x256xf32>,
    %c0_72 = arith.constant 0 : index
    %c35 = arith.constant 35 : index
    %134 = vector.load %arg7[%c0_72, %c35] : memref<2x324xf32, #tpu.memory_space<vmem>>, vector<2x256xf32>
    %cst_73 = arith.constant 0.000000e+00 : f32
    %135 = vector.shape_cast %58 : vector<1x256xi1> to vector<1x256xi1>
    %136 = vector.broadcast %135 : vector<1x256xi1> to vector<2x256xi1>
    %137 = vector.broadcast %cst_73 : f32 to vector<2x256xf32>
    %138 = arith.select %136, %134, %137 : vector<2x256xi1>, vector<2x256xf32>
    %c26 = arith.constant 26 : index
    %c0_74 = arith.constant 0 : index
    %139 = vector.load %arg8[%c26, %c0_74] : memref<50x256xf32, #tpu.memory_space<vmem>>, vector<2x256xf32>
    tpu.vector_store %arg8[%c26, %c0_74], %138 {strides = array<i32>} : memref<50x256xf32, #tpu.memory_space<vmem>>, vector<2x256xf32>,
    %c0_75 = arith.constant 0 : index
    %c36 = arith.constant 36 : index
    %140 = vector.load %arg7[%c0_75, %c36] : memref<2x324xf32, #tpu.memory_space<vmem>>, vector<2x256xf32>
    %cst_76 = arith.constant 0.000000e+00 : f32
    %141 = vector.shape_cast %67 : vector<1x256xi1> to vector<1x256xi1>
    %142 = vector.broadcast %141 : vector<1x256xi1> to vector<2x256xi1>
    %143 = vector.broadcast %cst_76 : f32 to vector<2x256xf32>
    %144 = arith.select %142, %140, %143 : vector<2x256xi1>, vector<2x256xf32>
    %c28 = arith.constant 28 : index
    %c0_77 = arith.constant 0 : index
    %145 = vector.load %arg8[%c28, %c0_77] : memref<50x256xf32, #tpu.memory_space<vmem>>, vector<2x256xf32>
    tpu.vector_store %arg8[%c28, %c0_77], %144 {strides = array<i32>} : memref<50x256xf32, #tpu.memory_space<vmem>>, vector<2x256xf32>,
    %c0_78 = arith.constant 0 : index
    %c48 = arith.constant 48 : index
    %146 = vector.load %arg7[%c0_78, %c48] : memref<2x324xf32, #tpu.memory_space<vmem>>, vector<2x256xf32>
    %cst_79 = arith.constant 0.000000e+00 : f32
    %147 = vector.shape_cast %40 : vector<1x256xi1> to vector<1x256xi1>
    %148 = vector.broadcast %147 : vector<1x256xi1> to vector<2x256xi1>
    %149 = vector.broadcast %cst_79 : f32 to vector<2x256xf32>
    %150 = arith.select %148, %146, %149 : vector<2x256xi1>, vector<2x256xf32>
    %c30 = arith.constant 30 : index
    %c0_80 = arith.constant 0 : index
    %151 = vector.load %arg8[%c30, %c0_80] : memref<50x256xf32, #tpu.memory_space<vmem>>, vector<2x256xf32>
    tpu.vector_store %arg8[%c30, %c0_80], %150 {strides = array<i32>} : memref<50x256xf32, #tpu.memory_space<vmem>>, vector<2x256xf32>,
    %c0_81 = arith.constant 0 : index
    %c49 = arith.constant 49 : index
    %152 = vector.load %arg7[%c0_81, %c49] : memref<2x324xf32, #tpu.memory_space<vmem>>, vector<2x256xf32>
    %cst_82 = arith.constant 0.000000e+00 : f32
    %153 = vector.shape_cast %49 : vector<1x256xi1> to vector<1x256xi1>
    %154 = vector.broadcast %153 : vector<1x256xi1> to vector<2x256xi1>
    %155 = vector.broadcast %cst_82 : f32 to vector<2x256xf32>
    %156 = arith.select %154, %152, %155 : vector<2x256xi1>, vector<2x256xf32>
    %c32_83 = arith.constant 32 : index
    %c0_84 = arith.constant 0 : index
    %157 = vector.load %arg8[%c32_83, %c0_84] : memref<50x256xf32, #tpu.memory_space<vmem>>, vector<2x256xf32>
    tpu.vector_store %arg8[%c32_83, %c0_84], %156 {strides = array<i32>} : memref<50x256xf32, #tpu.memory_space<vmem>>, vector<2x256xf32>,
    %c0_85 = arith.constant 0 : index
    %c50 = arith.constant 50 : index
    %158 = vector.load %arg7[%c0_85, %c50] : memref<2x324xf32, #tpu.memory_space<vmem>>, vector<2x256xf32>
    %c34_86 = arith.constant 34 : index
    %c0_87 = arith.constant 0 : index
    %159 = vector.load %arg8[%c34_86, %c0_87] : memref<50x256xf32, #tpu.memory_space<vmem>>, vector<2x256xf32>
    tpu.vector_store %arg8[%c34_86, %c0_87], %158 {strides = array<i32>} : memref<50x256xf32, #tpu.memory_space<vmem>>, vector<2x256xf32>,
    %c0_88 = arith.constant 0 : index
    %c51 = arith.constant 51 : index
    %160 = vector.load %arg7[%c0_88, %c51] : memref<2x324xf32, #tpu.memory_space<vmem>>, vector<2x256xf32>
    %cst_89 = arith.constant 0.000000e+00 : f32
    %161 = vector.shape_cast %58 : vector<1x256xi1> to vector<1x256xi1>
    %162 = vector.broadcast %161 : vector<1x256xi1> to vector<2x256xi1>
    %163 = vector.broadcast %cst_89 : f32 to vector<2x256xf32>
    %164 = arith.select %162, %160, %163 : vector<2x256xi1>, vector<2x256xf32>
    %c36_90 = arith.constant 36 : index
    %c0_91 = arith.constant 0 : index
    %165 = vector.load %arg8[%c36_90, %c0_91] : memref<50x256xf32, #tpu.memory_space<vmem>>, vector<2x256xf32>
    tpu.vector_store %arg8[%c36_90, %c0_91], %164 {strides = array<i32>} : memref<50x256xf32, #tpu.memory_space<vmem>>, vector<2x256xf32>,
    %c0_92 = arith.constant 0 : index
    %c52 = arith.constant 52 : index
    %166 = vector.load %arg7[%c0_92, %c52] : memref<2x324xf32, #tpu.memory_space<vmem>>, vector<2x256xf32>
    %cst_93 = arith.constant 0.000000e+00 : f32
    %167 = vector.shape_cast %67 : vector<1x256xi1> to vector<1x256xi1>
    %168 = vector.broadcast %167 : vector<1x256xi1> to vector<2x256xi1>
    %169 = vector.broadcast %cst_93 : f32 to vector<2x256xf32>
    %170 = arith.select %168, %166, %169 : vector<2x256xi1>, vector<2x256xf32>
    %c38 = arith.constant 38 : index
    %c0_94 = arith.constant 0 : index
    %171 = vector.load %arg8[%c38, %c0_94] : memref<50x256xf32, #tpu.memory_space<vmem>>, vector<2x256xf32>
    tpu.vector_store %arg8[%c38, %c0_94], %170 {strides = array<i32>} : memref<50x256xf32, #tpu.memory_space<vmem>>, vector<2x256xf32>,
    %c0_95 = arith.constant 0 : index
    %c64 = arith.constant 64 : index
    %172 = vector.load %arg7[%c0_95, %c64] : memref<2x324xf32, #tpu.memory_space<vmem>>, vector<2x256xf32>
    %cst_96 = arith.constant 0.000000e+00 : f32
    %173 = vector.shape_cast %40 : vector<1x256xi1> to vector<1x256xi1>
    %174 = vector.broadcast %173 : vector<1x256xi1> to vector<2x256xi1>
    %175 = vector.broadcast %cst_96 : f32 to vector<2x256xf32>
    %176 = arith.select %174, %172, %175 : vector<2x256xi1>, vector<2x256xf32>
    %c40 = arith.constant 40 : index
    %c0_97 = arith.constant 0 : index
    %177 = vector.load %arg8[%c40, %c0_97] : memref<50x256xf32, #tpu.memory_space<vmem>>, vector<2x256xf32>
    tpu.vector_store %arg8[%c40, %c0_97], %176 {strides = array<i32>} : memref<50x256xf32, #tpu.memory_space<vmem>>, vector<2x256xf32>,
    %c0_98 = arith.constant 0 : index
    %c65 = arith.constant 65 : index
    %178 = vector.load %arg7[%c0_98, %c65] : memref<2x324xf32, #tpu.memory_space<vmem>>, vector<2x256xf32>
    %cst_99 = arith.constant 0.000000e+00 : f32
    %179 = vector.shape_cast %49 : vector<1x256xi1> to vector<1x256xi1>
    %180 = vector.broadcast %179 : vector<1x256xi1> to vector<2x256xi1>
    %181 = vector.broadcast %cst_99 : f32 to vector<2x256xf32>
    %182 = arith.select %180, %178, %181 : vector<2x256xi1>, vector<2x256xf32>
    %c42 = arith.constant 42 : index
    %c0_100 = arith.constant 0 : index
    %183 = vector.load %arg8[%c42, %c0_100] : memref<50x256xf32, #tpu.memory_space<vmem>>, vector<2x256xf32>
    tpu.vector_store %arg8[%c42, %c0_100], %182 {strides = array<i32>} : memref<50x256xf32, #tpu.memory_space<vmem>>, vector<2x256xf32>,
    %c0_101 = arith.constant 0 : index
    %c66 = arith.constant 66 : index
    %184 = vector.load %arg7[%c0_101, %c66] : memref<2x324xf32, #tpu.memory_space<vmem>>, vector<2x256xf32>
    %c44 = arith.constant 44 : index
    %c0_102 = arith.constant 0 : index
    %185 = vector.load %arg8[%c44, %c0_102] : memref<50x256xf32, #tpu.memory_space<vmem>>, vector<2x256xf32>
    tpu.vector_store %arg8[%c44, %c0_102], %184 {strides = array<i32>} : memref<50x256xf32, #tpu.memory_space<vmem>>, vector<2x256xf32>,
    %c0_103 = arith.constant 0 : index
    %c67 = arith.constant 67 : index
    %186 = vector.load %arg7[%c0_103, %c67] : memref<2x324xf32, #tpu.memory_space<vmem>>, vector<2x256xf32>
    %cst_104 = arith.constant 0.000000e+00 : f32
    %187 = vector.shape_cast %58 : vector<1x256xi1> to vector<1x256xi1>
    %188 = vector.broadcast %187 : vector<1x256xi1> to vector<2x256xi1>
    %189 = vector.broadcast %cst_104 : f32 to vector<2x256xf32>
    %190 = arith.select %188, %186, %189 : vector<2x256xi1>, vector<2x256xf32>
    %c46 = arith.constant 46 : index
    %c0_105 = arith.constant 0 : index
    %191 = vector.load %arg8[%c46, %c0_105] : memref<50x256xf32, #tpu.memory_space<vmem>>, vector<2x256xf32>
    tpu.vector_store %arg8[%c46, %c0_105], %190 {strides = array<i32>} : memref<50x256xf32, #tpu.memory_space<vmem>>, vector<2x256xf32>,
    %c0_106 = arith.constant 0 : index
    %c68 = arith.constant 68 : index
    %192 = vector.load %arg7[%c0_106, %c68] : memref<2x324xf32, #tpu.memory_space<vmem>>, vector<2x256xf32>
    %cst_107 = arith.constant 0.000000e+00 : f32
    %193 = vector.shape_cast %67 : vector<1x256xi1> to vector<1x256xi1>
    %194 = vector.broadcast %193 : vector<1x256xi1> to vector<2x256xi1>
    %195 = vector.broadcast %cst_107 : f32 to vector<2x256xf32>
    %196 = arith.select %194, %192, %195 : vector<2x256xi1>, vector<2x256xf32>
    %c48_108 = arith.constant 48 : index
    %c0_109 = arith.constant 0 : index
    %197 = vector.load %arg8[%c48_108, %c0_109] : memref<50x256xf32, #tpu.memory_space<vmem>>, vector<2x256xf32>
    tpu.vector_store %arg8[%c48_108, %c0_109], %196 {strides = array<i32>} : memref<50x256xf32, #tpu.memory_space<vmem>>, vector<2x256xf32>,
    %c0_110 = arith.constant 0 : index
    %c0_111 = arith.constant 0 : index
    %198 = vector.load %arg4[%c0_110, %c0_111] : memref<12x50xbf16, #tpu.memory_space<vmem>>, vector<12x50xbf16>
    %c0_112 = arith.constant 0 : index
    %c0_113 = arith.constant 0 : index
    %199 = vector.load %arg8[%c0_112, %c0_113] : memref<50x256xf32, #tpu.memory_space<vmem>>, vector<50x256xf32>
    %200 = arith.truncf %199 : vector<50x256xf32> to vector<50x256xbf16>
    %cst_114 = arith.constant dense<0.000000e+00> : vector<12x256xf32>
    %201 = tpu.matmul %198, %200, %cst_114 {dimension_numbers = #tpu.dot_dimension_numbers<[1], [0], [0], [1], [0, 0, 1, 1], [], []>} : vector<12x50xbf16>, vector<50x256xbf16>, vector<12x256xf32> -> vector<12x256xf32>
    %c0_115 = arith.constant 0 : index
    %c0_116 = arith.constant 0 : index
    %202 = vector.load %arg5[%c0_115, %c0_116] : memref<12x1xf32, #tpu.memory_space<vmem>>, vector<12x1xf32>
    %203 = vector.broadcast %202 : vector<12x1xf32> to vector<12x256xf32>
    %204 = arith.addf %201, %203 : vector<12x256xf32>
    %cst_117 = arith.constant 0.000000e+00 : f32
    %205 = vector.broadcast %cst_117 : f32 to vector<12x256xf32>
    %206 = arith.maximumf %204, %205 : vector<12x256xf32>
    %207 = vector.extract_strided_slice %206 {offsets = [0, 0], sizes = [4, 256], strides = [1, 1]} : vector<12x256xf32> to vector<4x256xf32>
    %208 = vector.extract_strided_slice %206 {offsets = [4, 0], sizes = [4, 256], strides = [1, 1]} : vector<12x256xf32> to vector<4x256xf32>
    %209 = arith.addf %207, %208 : vector<4x256xf32>
    %210 = vector.extract_strided_slice %206 {offsets = [8, 0], sizes = [4, 256], strides = [1, 1]} : vector<12x256xf32> to vector<4x256xf32>
    %211 = arith.addf %209, %210 : vector<4x256xf32>
    %cst_118 = arith.constant 0xFF800000 : f32
    %212 = vector.broadcast %cst_118 : f32 to vector<4x16xf32>
    %c0_119 = arith.constant 0 : index
    %c0_120 = arith.constant 0 : index
    %213 = vector.load %arg9[%c0_119, %c0_120] : memref<4x288xf32, #tpu.memory_space<vmem>>, vector<4x16xf32>
    tpu.vector_store %arg9[%c0_119, %c0_120], %212 {strides = array<i32>} : memref<4x288xf32, #tpu.memory_space<vmem>>, vector<4x16xf32>,
    %cst_121 = arith.constant 0xFF800000 : f32
    %214 = vector.broadcast %cst_121 : f32 to vector<4x16xf32>
    %c0_122 = arith.constant 0 : index
    %c272 = arith.constant 272 : index
    %215 = vector.load %arg9[%c0_122, %c272] : memref<4x288xf32, #tpu.memory_space<vmem>>, vector<4x16xf32>
    tpu.vector_store %arg9[%c0_122, %c272], %214 {strides = array<i32>} : memref<4x288xf32, #tpu.memory_space<vmem>>, vector<4x16xf32>,
    %c0_123 = arith.constant 0 : index
    %c16_124 = arith.constant 16 : index
    %216 = vector.load %arg9[%c0_123, %c16_124] : memref<4x288xf32, #tpu.memory_space<vmem>>, vector<4x256xf32>
    tpu.vector_store %arg9[%c0_123, %c16_124], %1 {strides = array<i32>} : memref<4x288xf32, #tpu.memory_space<vmem>>, vector<4x256xf32>,
    %c1_i32_125 = arith.constant 1 : i32
    %217 = vector.broadcast %c1_i32_125 : i32 to vector<1x256xi32>
    %218 = arith.cmpi sge, %18, %217 : vector<1x256xi32>
    %c0_126 = arith.constant 0 : index
    %c15 = arith.constant 15 : index
    %219 = vector.load %arg9[%c0_126, %c15] : memref<4x288xf32, #tpu.memory_space<vmem>>, vector<4x256xf32>
    %cst_127 = arith.constant 0xFF800000 : f32
    %220 = vector.shape_cast %218 : vector<1x256xi1> to vector<1x256xi1>
    %221 = vector.broadcast %220 : vector<1x256xi1> to vector<4x256xi1>
    %222 = vector.broadcast %cst_127 : f32 to vector<4x256xf32>
    %223 = arith.select %221, %219, %222 : vector<4x256xi1>, vector<4x256xf32>
    %c14_i32 = arith.constant 14 : i32
    %224 = vector.broadcast %c14_i32 : i32 to vector<1x256xi32>
    %225 = arith.cmpi sle, %18, %224 : vector<1x256xi32>
    %c0_128 = arith.constant 0 : index
    %c17_129 = arith.constant 17 : index
    %226 = vector.load %arg9[%c0_128, %c17_129] : memref<4x288xf32, #tpu.memory_space<vmem>>, vector<4x256xf32>
    %cst_130 = arith.constant 0xFF800000 : f32
    %227 = vector.shape_cast %225 : vector<1x256xi1> to vector<1x256xi1>
    %228 = vector.broadcast %227 : vector<1x256xi1> to vector<4x256xi1>
    %229 = vector.broadcast %cst_130 : f32 to vector<4x256xf32>
    %230 = arith.select %228, %226, %229 : vector<4x256xi1>, vector<4x256xf32>
    %231 = arith.maximumf %223, %1 : vector<4x256xf32>
    %232 = arith.maximumf %231, %230 : vector<4x256xf32>
    %c0_131 = arith.constant 0 : index
    %c16_132 = arith.constant 16 : index
    %233 = vector.load %arg9[%c0_131, %c16_132] : memref<4x288xf32, #tpu.memory_space<vmem>>, vector<4x256xf32>
    tpu.vector_store %arg9[%c0_131, %c16_132], %232 {strides = array<i32>} : memref<4x288xf32, #tpu.memory_space<vmem>>, vector<4x256xf32>,
    %c0_133 = arith.constant 0 : index
    %c0_134 = arith.constant 0 : index
    %234 = vector.load %arg9[%c0_133, %c0_134] : memref<4x288xf32, #tpu.memory_space<vmem>>, vector<4x256xf32>
    %235 = arith.maximumf %234, %232 : vector<4x256xf32>
    %c0_135 = arith.constant 0 : index
    %c32_136 = arith.constant 32 : index
    %236 = vector.load %arg9[%c0_135, %c32_136] : memref<4x288xf32, #tpu.memory_space<vmem>>, vector<4x256xf32>
    %237 = arith.maximumf %235, %236 : vector<4x256xf32>
    %238 = arith.addf %211, %237 : vector<4x256xf32>
    %c0_137 = arith.constant 0 : index
    %c0_138 = arith.constant 0 : index
    %c0_139 = arith.constant 0 : index
    %239 = vector.load %arg6[%c0_137, %c0_138, %c0_139] : memref<1x4x256xf32, #tpu.memory_space<vmem>>, vector<1x4x256xf32>
    %240 = vector.shape_cast %239 : vector<1x4x256xf32> to vector<4x256xf32>
    %241 = vector.shape_cast %238 : vector<4x256xf32> to vector<1x4x256xf32>
    tpu.vector_store %arg6[%c0_137, %c0_138, %c0_139], %241 {strides = array<i32>} : memref<1x4x256xf32, #tpu.memory_space<vmem>>, vector<1x4x256xf32>,
    return
  }
  func.func @transform_0(%arg0: i32) -> (i32, i32, i32) {
    %c0_i32 = arith.constant 0 : i32
    %c0_i32_0 = arith.constant 0 : i32
    %c0_i32_1 = arith.constant 0 : i32
    return %arg0, %c0_i32, %c0_i32_0 : i32, i32, i32
  }
  func.func @transform_1(%arg0: i32) -> (i32, i32) {
    %c0_i32 = arith.constant 0 : i32
    %c0_i32_0 = arith.constant 0 : i32
    %c0_i32_1 = arith.constant 0 : i32
    return %c0_i32, %c0_i32_0 : i32, i32
  }
  func.func @transform_2(%arg0: i32) -> (i32, i32) {
    %c0_i32 = arith.constant 0 : i32
    %c0_i32_0 = arith.constant 0 : i32
    %c0_i32_1 = arith.constant 0 : i32
    return %c0_i32, %c0_i32_0 : i32, i32
  }
  func.func @transform_3(%arg0: i32) -> (i32, i32) {
    %c0_i32 = arith.constant 0 : i32
    %c0_i32_0 = arith.constant 0 : i32
    %c0_i32_1 = arith.constant 0 : i32
    return %c0_i32, %c0_i32_0 : i32, i32
  }
  func.func @transform_4(%arg0: i32) -> (i32, i32) {
    %c0_i32 = arith.constant 0 : i32
    %c0_i32_0 = arith.constant 0 : i32
    %c0_i32_1 = arith.constant 0 : i32
    return %c0_i32, %c0_i32_0 : i32, i32
  }
  func.func @transform_5(%arg0: i32) -> (i32, i32, i32) {
    %c0_i32 = arith.constant 0 : i32
    %c0_i32_0 = arith.constant 0 : i32
    %c0_i32_1 = arith.constant 0 : i32
    return %arg0, %c0_i32, %c0_i32_0 : i32, i32, i32
  }
}

</mosaic_0001>

<bundles_post_ra>
// kernel: tpu_custom_call.1
= control target key start
LH: loop header
LB: loop body
LE: loop exit
PB: predicated region body
PF: predicated region fallthrough
CT: control target
= control target key end

     0   :  { %10 = vsyncpa [#allocation6], 0  ;;  %s2619_s0 = inlined_call_operand.vmem [shape: f32[2,4,256], index: 0, kind: input, shape index: {}]   ;;  %s2620_s1 = inlined_call_operand.hbm [shape: bf16[2,4], index: 1, kind: input, shape index: {}]   ;;  %s2621_s2 = inlined_call_operand.vmem [shape: f32[2,1], index: 2, kind: input, shape index: {}]   ;;  %s2622_s3 = inlined_call_operand.vmem [shape: bf16[12,50], index: 3, kind: input, shape index: {}]   ;;  %s2623_s4 = inlined_call_operand.vmem [shape: f32[12,1], index: 4, kind: input, shape index: {}]   ;;  %s2624_s5 = inlined_call_operand.hbm [shape: f32[2,4,256], index: 5, kind: output, shape index: {}]  }
   0x1   :  { %11 = vsyncpa [#allocation7], 0 }
   0x2   :  { %13 = vsyncpa [#allocation7 + $0x1], 0  ;;  %s1877_s18 = smov 0   ;;  %s1879_s19 = smov 0  }
   0x3   :  { %s1881_s20 = smov 0   ;;  %s1883_s21 = smov 0  }
   0x4 LB: > { %s1898_s22 = sadd.s32 4294967295, %s1812_s21   ;;  %s1585_s23 = sadd.s32 4294967294, %s1812_s21   ;;  %s1812_s21 = sphi %s1883_s21, %s2663_s21   ;;  %s1808_s20 = sphi %s1881_s20, %s2662_s20   ;;  %s1804_s19 = sphi %s1879_s19, %s2661_s19   ;;  %s1800_s18 = sphi %s1877_s18, %s2660_s18  }
   0x5   : > { %s1902_s24 = sadd.s32 1, %s1812_s21   ;;  %s136_s25 = sadd.s32 1, %s1808_s20 }
   0x6   : > { %s133_s26 = ssub.s32 %s1812_s21, %s1902_s24  ;;  %p146_p0 = scmp.ne.s32.totalorder %s1808_s20, %s1804_s19 }
   0x7   : > { %p134_p1 = scmp.eq.s32.totalorder %s133_s26, 0  ;;  %p147_p2 = scmp.eq.s32.totalorder %s1898_s22, 1 }
   0x8   : > { %p152_p3 = scmp.ne.s32.totalorder %s1804_s19, %s1800_s18  ;;  %p153_p4 = scmp.eq.s32.totalorder %s1585_s23, 1 }
   0x9   : > { %s1913_s27 = scalar_select %p134_p1, %s1808_s20, %s136_s25  }
   0xa   : > { %p1915_p5 = por %p147_p2, %p146_p0  ;;  %p1919_p6 = por %p153_p4, %p152_p3 }
   0xb   : > { %p1586_p7 = scmp.ge.s32.totalorder %s1812_s21, 1  ;;  %p160_p8 = scmp.lt.s32.totalorder %s1812_s21, 3 }
   0xc   : > { %s2642_s28 = scalar_select %p1915_p5, 1, 0 }
   0xd   : > { %s2643_s29 = scalar_select %p1919_p6, 1, 0 }
   0xe   : > { %p2625_p9 = scmp.eq.s32.totalorder %s1898_s22, 0  ;;  %p1926_p10 = pnand %p1586_p7, %p160_p8 }
   0xf   : > { %s1814_s6 = smov [#allocation5]   ;;  %s1718_s11 = scalar_lea.hbm %s2620_s1, 16 }
  0x10   : > { %s2644_s30 = scalar_select %p1926_p10, 1, 0 }
  0x11   : > { %s173_s7 = sshll.u32 %s1814_s6, 4  ;;  %p1613_p11 = pneg %p1926_p10  ;;  %s174_s7 = int_to_ptr.vmem [resolvable:$true] %s173_s7 }
  0x12   : > { %p1719_p13 = scmp.ne.s32.totalorder %s2620_s1, %s1718_s11  ;;  %p1725_p3 = scmp.lt.u32.totalorder %s1718_s11, %s2620_s1 }
  0x13   : > { %p1934_p12 = pnand %p2625_p9, %p1613_p11 }
  0x15   : > { %p1720_p0 = pneg %p1934_p12 }
  0x17   : > { %p1721_p1 = pnand %p1720_p0, %p1719_p13 }
  0x19   : > { %p1722_p2 = pneg %p1721_p1 }
  0x1b   : > { %p1727_p4 = pnand %p1725_p3, %p1722_p2 }
  0x1d   : > { %1730 = shalt.err (!%p1727_p4)
}
  0x1e   : > { %s1731_s16 = scalar_lea.vmem %s174_s7, 16  ;;  %s1738_s17 = scalar_lea.vmem %s174_s7, 32 }
  0x1f   : > { %p1732_p7 = scmp.ne.s32.totalorder %s174_s7, %s1731_s16  ;;  %p1739_p9 = scmp.lt.s32.totalorder %s174_s7, %s174_s7 }
  0x20   : > { %p1740_p6 = scmp.lt.s32.totalorder %s1738_s17, %s1731_s16 }
  0x21   : > { %p1734_p8 = pnand %p1732_p7, %p1720_p0 }
  0x22   : > { %p1741_p5 = por %p1740_p6, %p1739_p9 }
  0x23   : > { %p1735_p11 = pneg %p1734_p8 }
  0x25   : > { %p1742_p10 = pnand %p1741_p5, %p1735_p11 }
  0x27   : > { %1745 = shalt.err (!%p1742_p10)
}
  0x28   : > { %1616 = dma.hbm_to_vmem [thread:$0]  (!%p1934_p12), %s2620_s1, 16, %s174_s7, [#allocation6]  }
  0x29   : > { %p2646_p13 = scmp.ne.s32.totalorder %s2644_s30, 0 }
  0x2a   : > { %p2647_p1 = scmp.eq.s32.totalorder (!%p2646_p13), %s1898_s22, 0 }
  0x2b   : > { %203 = sbr.rel (%p2646_p13) target bundleno = 1080 (0x438), region = 40 }
  0x32   : > { %1791 = dma.done.wait (%p2647_p1), [#allocation6], 16   ;;  %p2648_p0 = pmov %p2647_p1 }
  0x33   : > { %p231_p6 = scmp.lt.s32.totalorder %s1898_s22, 1  ;;  %v1815_v0 = vmov 0   ;;  %vm281_vm0 = vcmask 1041408   ;;  %v271_v2 = vld [vmem:[%s2621_s2] sm:$0x3]  ;;  %vm277_vm1 = vcmask 31744   ;;  %v238_v9 = vlaneseq }
  0x34   : > { %1793 = vsyncadd (%p2648_p0), [#allocation6], 4294967280  ;;  %320 = vmatprep.mubr.bf16.mxu0 %v1815_v0  ;;  %1688 = vset.pattern.permute.xlu0 %v1815_v0  ;;  %v265_v7 = vld [vmem:[#allocation5] sm:$0x1]  ;;  %vm331_vm2 = vcmask 271360   ;;  %vm333_vm3 = vcmask 550160  }
  0x35   : > { %s232_s26 = scalar_select %p231_p6, %s1898_s22, 1  ;;  %1374 = vmatprep.mubr.bf16.mxu1 %v1815_v0  ;;  %1689 = vset.pattern.permute.xlu1 %v1815_v0  ;;  %v1816_v8 = vmov 0.0   ;;  %v1817_v10 = vmov 1983009808   ;;  %v342_v15 = vshrl.u32 %v238_v9, 7  ;;  %vm351_vm4 = vcmask 1041680  }
  0x36   : > { %274 = vperm.xlu0 %1688, %v271_v2   ;;  %332 = vst.msk [vmem:[#allocation2] sm:$0x3] %vm331_vm2, %v1816_v8  ;;  %v339_v11 = vunpack.c.l.s4 %v1817_v10  ;;  %s1818_s11 = smov 34   ;;  %vm352_vm5 = vcmask 1043458   ;;  %vm354_vm7 = vcmask 275460   ;;  %vm348_vm8 = vcmask 277504  }
  0x37   : > { %s1605_s6 = sshll.u32 %s232_s26, 3  ;;  %334 = vst.msk [vmem:[#allocation2 + $0x4] sm:$0x3] %vm333_vm3, %v1816_v8  ;;  %vm353_vm6 = vmor %vm352_vm5, %vm351_vm4  ;;  %v239_v29 = vand.u32 127, %v238_v9  ;;  %s1819_s12 = smov 125   ;;  %vm1399_vm12 = vcmask 125952  }
  0x38   : > { %s1965_s30 = scalar_lea.vmem %s2619_s0, %s1605_s6  ;;  %v340_v14 = vunpack.c.0.s8 %v339_v11  ;;  %vm355_vm9 = vmor %vm354_vm7, %vm353_vm6  ;;  %s1820_s13 = smov 127   ;;  %vm1401_vm13 = vcmask 257152   ;;  %vm512_vm14 = vcmask 1022976   ;;  %vm437_vm15 = vcmask 1039360  }
  0x39   : > { %v1968_v1 = vld [vmem:[%s1965_s30] sm:$0xff]  ;;  %v1988_v32 = vand.u32 15, %v239_v29  ;;  %s1821_s14 = smov 111   ;;  %s1822_s15 = smov 112   ;;  %v240_v50 = vadd.s32 128, %v239_v29  ;;  %vm588_vm2 = vcmask 916480  }
  0x3a   : > { %v1975_v3 = vcombine.high %v1968_v1, %v1968_v1  ;;  %v269_v4 = vpack.c.bf16 %v1968_v1, %v1968_v1  ;;  %v1981_v23 = vsub.s32 %v340_v14, %v342_v15  ;;  %s1823_s16 = smov 108   ;;  %s1824_s17 = smov 126   ;;  %vm627_vm4 = vcmask 908288  }
  0x3b   : > { %v2007_v37 = vadd.s32 4294967294, %v1988_v32  ;;  %s1825_s23 = smov 95   ;;  %s1826_s25 = smov 124   ;;  %v2068_v55 = vand.u32 15, %v240_v50  ;;  %vm555_vm6 = vcmask 1014784  }
  0x3c   : > { %v270_v5 = vpack.c.bf16 %v1975_v3, %v1975_v3  ;;  %v283_v6 = vsel %vm281_vm0, %v269_v4, 0  ;;  %s1827_s26 = smov 92   ;;  %s1828_s6 = smov 96  }
  0x3d   : > { %vm359_vm10 = vcmp.ge.s32.totalorder %v2007_v37, 0  ;;  %v2087_v60 = vadd.s32 4294967294, %v2068_v55  ;;  %s2630_s7 = smov 109   ;;  %s1830_s8 = smov 93  }
  0x3e   : > { %1594 = vmatprep.subr.msk.bf16.mxu0 %vm281_vm0, %v270_v5  ;;  %s2628_s9 = smov 77   ;;  %s2636_s10 = smov 80  }
  0x3f   : > { %289 = vmatpush1.bf16.msra.mxu0 %v283_v6  ;;  %vm360_vm11 = vcmp.ge.s32.totalorder %v2087_v60, 0  ;;  %p2658_p9 = scmp.ne.s32.totalorder %s2642_s28, 0 }
  0x42   : > { %1595 = vmatmul.mubr.msk.bf16.vlgmr.msra.gmra.mrb[0].mxu0 %vm277_vm1, %v265_v7 }
  0xb5   : > { %v275_v12 = vpop.permute.xlu0 %274 }
 0x115   : > { %v322_v13 = vpop.f32.mrb[0].mxu0 }
 0x116   : > { %v323_v16 = vadd.f32 %v322_v13, %v275_v12  ;;  %v324_v17 = vpop.f32.mrb[1].mxu0 }
 0x117   : > { %v325_v18 = vadd.f32 %v324_v17, %v275_v12  ;;  %v326_v19 = vpop.f32.mrb[2].mxu0 }
 0x118   : > { %v329_v20 = vmax.f32 %v323_v16, 0.0  ;;  %v327_v21 = vpop.f32.mrb[3].mxu0 }
 0x119   : > { %v330_v22 = vmax.f32 %v325_v18, 0.0 }
 0x11b   : > { %v337_v24 = vcombine.low %v329_v20, %v330_v22 }
 0x11d   : > { %v344_v25 = vrot.slane %v337_v24, %v1981_v23 }
 0x11f   : > { %345 = vrot.lane.b32.xlu0 %v344_v25, %s1818_s11  ;;  %s2632_s11 = smov 63  }
 0x191   : > { %v346_v26 = vpop.permute.xlu0 %345 }
 0x192   : > { %v347_v27 = vrot.slane %v346_v26, 6 }
 0x194   : > { %v349_v28 = vsel %vm348_vm8, %v347_v27, %v346_v26 }
 0x195   : > { %356 = vst.msk [vmem:[#allocation2] sm:$0x3f] %vm355_vm9, %v349_v28  ;;  %vm667_vm9 = vcmask 900096  }
 0x19c   : > { %v1984_v30 = vld [vmem:[#allocation2] sm:$0x3f] }
 0x19d   : > { %v1986_v31 = vld [vmem:[#allocation2] sm:$0x3f]  ;;  %v1992_v33 = vrot.slane %v1984_v30, %v1981_v23  ;;  %v490_v25 = vcombine.high %v1984_v30, %v1984_v30 }
 0x19e   : > { %v1996_v34 = vrot.slane %v1986_v31, %v1981_v23  ;;  %v1998_v35 = vld [vmem:[#allocation2] sm:$0x3f]  ;;  %v415_v24 = vcombine.high %v1986_v31, %v1986_v31 }
 0x19f   : > { %v2000_v36 = vld [vmem:[#allocation2] sm:$0x3f]  ;;  %506 = vrot.lane.b32.xlu1 %v1992_v33, %s1819_s12  ;;  %v2011_v38 = vrot.slane %v1998_v35, %v1981_v23  ;;  %v505_v21 = vcombine.high %v1992_v33, %v1992_v33  ;;  %v504_v29 = vrot.slane %v490_v25, %v1981_v23 }
 0x1a0   : > { %431 = vrot.lane.b32.xlu0 %v1996_v34, %s1820_s13  ;;  %v2015_v39 = vrot.slane %v2000_v36, %v1981_v23  ;;  %v2017_v40 = vld [vmem:[#allocation2] sm:$0x3f]  ;;  %v430_v22 = vcombine.high %v1996_v34, %v1996_v34  ;;  %v429_v27 = vrot.slane %v415_v24, %v1981_v23  ;;  %v566_v31 = vcombine.high %v2000_v36, %v2000_v36 }
 0x1a1   : > { %v2019_v41 = vld [vmem:[#allocation2] sm:$0x3f]  ;;  %v2028_v43 = vrot.slane %v2017_v40, %v1981_v23  ;;  %v620_v28 = vcombine.high %v2011_v38, %v2011_v38 }
 0x1a2   : > { %v1596_v42 = vld.sshfl [vmem:[#allocation2] sm:$0x33 pattern:$0x76325410]  ;;  %v2032_v44 = vrot.slane %v2019_v41, %v1981_v23  ;;  %v581_v26 = vcombine.high %v2015_v39, %v2015_v39  ;;  %v580_v34 = vrot.slane %v566_v31, %v1981_v23 }
 0x1a3   : > { %621 = vrot.lane.b32.xlu1 %v2011_v38, %s1821_s14  ;;  %v2034_v45 = vld [vmem:[#allocation2] sm:$0x3f]  ;;  %v405_v47 = vsel %vm359_vm10, %v1596_v42, 0.0  ;;  %v402_v5 = vcombine.high %v1596_v42, %v1596_v42  ;;  %v605_v38 = vcombine.high %v1998_v35, %v1998_v35 }
 0x1a4   : > { %582 = vrot.lane.b32.xlu0 %v2015_v39, %s1822_s15  ;;  %v2036_v46 = vld [vmem:[#allocation2] sm:$0x3f]  ;;  %407 = vst [vmem:[#allocation3] sm:$0x3] %v405_v47  ;;  %v2046_v48 = vrot.slane %v2034_v45, %v1981_v23  ;;  %v709_v47 = vcombine.high %v2017_v40, %v2017_v40 }
 0x1a5   : > { %v2050_v49 = vrot.slane %v2036_v46, %v1981_v23  ;;  %v2052_v51 = vld [vmem:[#allocation2] sm:$0x3f]  ;;  %v406_v6 = vsel %vm360_vm11, %v402_v5, 0.0  ;;  %v619_v42 = vrot.slane %v605_v38, %v1981_v23 }
 0x1a6   : > { %v2054_v52 = vld [vmem:[#allocation2] sm:$0x3f]  ;;  %v2062_v53 = vrot.slane %v2052_v51, %v1981_v23  ;;  %408 = vst [vmem:[#allocation3 + $0x8] sm:$0x3] %v406_v6  ;;  %v723_v35 = vrot.slane %v709_v47, %v1981_v23  ;;  %v896_v25 = vcombine.high %v2052_v51, %v2052_v51  ;;  %v802_v51 = vcombine.high %v2046_v48, %v2046_v48 }
 0x1a7   : > { %725 = vrot.lane.b32.xlu1 %v2028_v43, %s1823_s16  ;;  %v2066_v54 = vrot.slane %v2054_v52, %v1981_v23  ;;  %v2070_v56 = vld [vmem:[#allocation2] sm:$0x3f]  ;;  %v548_v30 = vcombine.high %v2050_v49, %v2050_v49  ;;  %v748_v5 = vcombine.high %v2054_v52, %v2054_v52 }
 0x1a8   : > { %473 = vrot.lane.b32.xlu0 %v2032_v44, %s1824_s17  ;;  %v2072_v57 = vld [vmem:[#allocation2] sm:$0x3f]  ;;  %v2080_v58 = vrot.slane %v2070_v56, %v1981_v23 }
 0x1a9   : > { %v2084_v59 = vrot.slane %v2072_v57, %v1981_v23  ;;  %v2089_v61 = vld [vmem:[#allocation2] sm:$0x3f]  ;;  %v762_v40 = vrot.slane %v748_v5, %v1981_v23 }
 0x1aa   : > { %v2091_v62 = vld [vmem:[#allocation2] sm:$0x3f]  ;;  %v2099_v63 = vrot.slane %v2089_v61, %v1981_v23 }
 0x1ab   : > { %803 = vrot.lane.b32.xlu1 %v2046_v48, %s1825_s23  ;;  %v2103_v0 = vrot.slane %v2091_v62, %v1981_v23  ;;  %v2106_v2 = vld [vmem:[#allocation2] sm:$0x3f]  ;;  %v911_v48 = vcombine.high %v2062_v53, %v2062_v53 }
 0x1ac   : > { %549 = vrot.lane.b32.xlu0 %v2050_v49, %s1826_s25  ;;  %v2108_v4 = vld [vmem:[#allocation2] sm:$0x3f]  ;;  %v2118_v7 = vrot.slane %v2106_v2, %v1981_v23  ;;  %v533_v49 = vcombine.high %v2036_v46, %v2036_v46 }
 0x1ad   : > { %v2122_v8 = vrot.slane %v2108_v4, %v1981_v23  ;;  %v2124_v9 = vld [vmem:[#allocation2] sm:$0x3f] }
 0x1ae   : > { %v2126_v10 = vld [vmem:[#allocation2] sm:$0x3f]  ;;  %v2134_v11 = vrot.slane %v2124_v9, %v1981_v23  ;;  %v547_v50 = vrot.slane %v533_v49, %v1981_v23 }
 0x1af   : > { %912 = vrot.lane.b32.xlu1 %v2062_v53, %s1827_s26  ;;  %v2138_v12 = vrot.slane %v2126_v10, %v1981_v23  ;;  %v2140_v13 = vld [vmem:[#allocation2] sm:$0x3f]  ;;  %v1077_v31 = vcombine.high %v2126_v10, %v2126_v10 }
 0x1b0   : > { %764 = vrot.lane.b32.xlu0 %v2066_v54, %s1828_s6  ;;  %v2142_v14 = vld [vmem:[#allocation2] sm:$0x3f]  ;;  %v1021_v15 = vrot.slane %v2140_v13, %v1981_v23 }
 0x1b1   : > { %v2152_v16 = vrot.slane %v2142_v14, %v1981_v23  ;;  %v2154_v17 = vld [vmem:[#allocation2] sm:$0x3f]  ;;  %v1091_v53 = vrot.slane %v1077_v31, %v1981_v23 }
 0x1b2   : > { %v2156_v18 = vld [vmem:[#allocation2] sm:$0x3f]  ;;  %v2163_v19 = vrot.slane %v2154_v17, %v1981_v23 }
 0x1b3   : > { %692 = vrot.lane.b32.xlu1 %v2080_v58, %s2630_s7  ;;  %s2638_s7 = smov 79   ;;  %v2167_v20 = vrot.slane %v2156_v18, %v1981_v23  ;;  %v642_v33 = vld [vmem:[#allocation2] sm:$0x3f]  ;;  %v1235_v49 = vcombine.high %v2152_v16, %v2152_v16 }
 0x1b4   : > { %873 = vrot.lane.b32.xlu0 %v2084_v59, %s1830_s8  ;;  %v658_v39 = vrot.slane %v642_v33, %v1981_v23  ;;  %v644_v6 = vcombine.low %v642_v33, %v642_v33  ;;  %v826_v33 = vcombine.high %v2108_v4, %v2108_v4  ;;  %v974_v4 = vcombine.high %v2124_v9, %v2124_v9 }
 0x1b5   : > { %v1203_v47 = vcombine.low %v2163_v19, %v2163_v19 }
 0x1b6   : > { %v660_v36 = vcombine.low %v658_v39, %v658_v39  ;;  %v2218_v46 = vrot.slane %v644_v6, %v1981_v23  ;;  %v840_v10 = vrot.slane %v826_v33, %v1981_v23  ;;  %v1116_v39 = vcombine.high %v2156_v18, %v2156_v18 }
 0x1b7   : > { %1054 = vrot.lane.b32.xlu1 %v2099_v63, %s2628_s9  ;;  %s2634_s9 = smov 94  }
 0x1b8   : > { %951 = vrot.lane.b32.xlu0 %v2103_v0, %s2636_s10  ;;  %s1838_s10 = smov 61   ;;  %v1130_v9 = vrot.slane %v1116_v39, %v1981_v23 }
 0x1bb   : > { %1165 = vrot.lane.b32.xlu1 %v2118_v7, %s2632_s11  ;;  %s2640_s11 = smov 76  }
 0x1bc   : > { %842 = vrot.lane.b32.xlu0 %v2122_v8, %s2634_s9  ;;  %s1837_s9 = smov 78  }
 0x1bf   : > { %990 = vrot.lane.b32.xlu1 %v2134_v11, %s2638_s7  ;;  %s1839_s7 = smov 62  }
 0x1c0   : > { %1093 = vrot.lane.b32.xlu0 %v2138_v12, %s2640_s11  ;;  %s1840_s11 = smov 64  }
 0x1c3   : > { %1027 = vrot.lane.b32.xlu1 %v1021_v15, %s1837_s9  ;;  %v787_v15 = vcombine.high %v2034_v45, %v2034_v45  ;;  %v724_v45 = vcombine.high %v2028_v43, %v2028_v43 }
 0x1c4   : > { %1236 = vrot.lane.b32.xlu0 %v2152_v16, %s1838_s10  ;;  %v989_v16 = vcombine.high %v2134_v11, %v2134_v11  ;;  %v1131_v11 = vcombine.high %v2167_v20, %v2167_v20 }
 0x1c5   : > { %v801_v52 = vrot.slane %v787_v15, %v1981_v23 }
 0x1c7   : > { %1207 = vrot.lane.b32.xlu1 %v2163_v19, %s1839_s7  ;;  %v659_v19 = vcombine.low %v2218_v46, %v2218_v46 }
 0x1c8   : > { %1132 = vrot.lane.b32.xlu0 %v2167_v20, %s1840_s11 }
 0x1cb   : > { %433 = vrot.lane.b32.xlu1 %v430_v22, %s1820_s13  ;;  %v857_v22 = vcombine.high %v2072_v57, %v2072_v57  ;;  %v763_v57 = vcombine.high %v2066_v54, %v2066_v54 }
 0x1cc   : > { %508 = vrot.lane.b32.xlu0 %v505_v21, %s1819_s12  ;;  %v469_v21 = vcombine.low %v2032_v44, %v2032_v44  ;;  %v910_v44 = vrot.slane %v896_v25, %v1981_v23 }
 0x1cd   : > { %v871_v24 = vrot.slane %v857_v22, %v1981_v23 }
 0x1cf   : > { %435 = vrot.lane.b32.xlu1 %v429_v27, %s1820_s13  ;;  %v676_v27 = vcombine.high %v2070_v56, %v2070_v56  ;;  %s2649_s13 = smov 80   ;;  %v1038_v56 = vcombine.high %v2089_v61, %v2089_v61  ;;  %v691_v61 = vcombine.high %v2080_v58, %v2080_v58 }
 0x1d0   : > { %584 = vrot.lane.b32.xlu0 %v581_v26, %s1822_s15  ;;  %v935_v26 = vcombine.high %v2091_v62, %v2091_v62  ;;  %v872_v62 = vcombine.high %v2084_v59, %v2084_v59  ;;  %v950_v59 = vcombine.high %v2103_v0, %v2103_v0 }
 0x1d1   : > { %v690_v54 = vrot.slane %v676_v27, %v1981_v23 }
 0x1d2   : > { %v949_v43 = vrot.slane %v935_v26, %v1981_v23 }
 0x1d3   : > { %510 = vrot.lane.b32.xlu1 %v504_v29, %s1819_s12  ;;  %s1841_s12 = smov 110   ;;  %v1052_v29 = vrot.slane %v1038_v56, %v1981_v23 }
 0x1d4   : > { %623 = vrot.lane.b32.xlu0 %v620_v28, %s1821_s14  ;;  %v841_v28 = vcombine.high %v2122_v8, %v2122_v8  ;;  %v1149_v8 = vcombine.high %v2106_v2, %v2106_v2  ;;  %v1053_v2 = vcombine.high %v2099_v63, %v2099_v63 }
 0x1d6   : > { %v1163_v0 = vrot.slane %v1149_v8, %v1981_v23 }
 0x1d7   : > { %586 = vrot.lane.b32.xlu1 %v580_v34, %s1822_s15  ;;  %s2650_s15 = smov 109   ;;  %v988_v34 = vrot.slane %v974_v4, %v1981_v23  ;;  %v2405_v4 = vadd.s32 1, %v2068_v55 }
 0x1d8   : > { %551 = vrot.lane.b32.xlu0 %v548_v30, %s1826_s25  ;;  %v1220_v30 = vcombine.high %v2142_v14, %v2142_v14  ;;  %v1092_v14 = vcombine.high %v2138_v12, %v2138_v12  ;;  %v1007_v12 = vcombine.low %v2140_v13, %v2140_v13  ;;  %v1188_v13 = vcombine.high %v2154_v17, %v2154_v17 }
 0x1d9   : > { %vm378_vm5 = vcmp.le.s32.totalorder %v2405_v4, 15 }
 0x1da   : > { %v1234_v58 = vrot.slane %v1220_v30, %v1981_v23  ;;  %v1014_v5 = vrot.slane %v1007_v12, %v1981_v23 }
 0x1db   : > { %625 = vrot.lane.b32.xlu1 %v619_v42, %s1821_s14 }
 0x1dc   : > { %665 = vrot.lane.b32.xlu0 %v660_v36, %s1841_s12  ;;  %v1164_v36 = vcombine.high %v2118_v7, %v2118_v7  ;;  %v454_v7 = vcombine.high %v2019_v41, %v2019_v41  ;;  %v1842_v41 = vmov -inf  }
 0x1dd   : > { %1400 = vst.msk [vmem:[#allocation4] sm:$0xf] %vm1399_vm12, %v1842_v41 }
 0x1de   : > { %1402 = vst.msk [vmem:[#allocation4 + $0x8] sm:$0xf] %vm1401_vm13, %v1842_v41  ;;  %v468_v15 = vrot.slane %v454_v7, %v1981_v23  ;;  %vm477_vm13 = vcmask 1031168  }
 0x1df   : > { %553 = vrot.lane.b32.xlu1 %v547_v50, %s1826_s25  ;;  %s2653_s25 = smov 76  }
 0x1e0   : > { %729 = vrot.lane.b32.xlu0 %v723_v35, %s1823_s16 }
 0x1e3   : > { %663 = vrot.lane.b32.xlu1 %v2218_v46, %s1841_s12  ;;  %v1202_v46 = vrot.slane %v1188_v13, %v1981_v23 }
 0x1e4   : > { %768 = vrot.lane.b32.xlu0 %v762_v40, %s1828_s6  ;;  %v1022_v40 = vcombine.high %v1014_v5, %v1014_v5 }
 0x1e7   : > { %471 = vrot.lane.b32.xlu1 %v469_v21, %s1824_s17 }
 0x1e8   : > { %807 = vrot.lane.b32.xlu0 %v801_v52, %s1825_s23  ;;  %v1257_v52 = vld [vmem:[#allocation2] sm:$0x3f] }
 0x1e9   : > { %v1266_v25 = vrot.slane %v1257_v52, %v1981_v23 }
 0x1eb   : > { %727 = vrot.lane.b32.xlu1 %v724_v45, %s1823_s16  ;;  %s2651_s16 = smov 94   ;;  %v470_v45 = vcombine.low %v468_v15, %v468_v15 }
 0x1ec   : > { %877 = vrot.lane.b32.xlu0 %v871_v24, %s1830_s8  ;;  %v1204_v24 = vcombine.low %v1202_v46, %v1202_v46 }
 0x1ef   : > { %766 = vrot.lane.b32.xlu1 %v763_v57, %s1828_s6  ;;  %v1274_v57 = vcombine.high %v1266_v25, %v1266_v25 }
 0x1f0   : > { %916 = vrot.lane.b32.xlu0 %v910_v44, %s1827_s26 }
 0x1f3   : > { %805 = vrot.lane.b32.xlu1 %v802_v51, %s1825_s23  ;;  %s2652_s23 = smov 77   ;;  %v1259_v51 = vcombine.high %v1257_v52, %v1257_v52 }
 0x1f4   : > { %955 = vrot.lane.b32.xlu0 %v949_v43, %s2649_s13 }
 0x1f7   : > { %875 = vrot.lane.b32.xlu1 %v872_v62, %s1830_s8  ;;  %s2655_s8 = smov 79   ;;  %v1273_v62 = vrot.slane %v1259_v51, %v1981_v23  ;;  %v2393_v23 = vadd.s32 4294967295, %v2068_v55 }
 0x1f8   : > { %696 = vrot.lane.b32.xlu0 %v690_v54, %s2650_s15 }
 0x1f9   : > { %vm368_vm3 = vcmp.ge.s32.totalorder %v2393_v23, 0 }
 0x1fb   : > { %914 = vrot.lane.b32.xlu1 %v911_v48, %s1827_s26  ;;  %s2654_s26 = smov 63  }
 0x1fc   : > { %844 = vrot.lane.b32.xlu0 %v841_v28, %s2651_s16 }
 0x1ff   : > { %953 = vrot.lane.b32.xlu1 %v950_v59, %s2649_s13  ;;  %v2381_v59 = vadd.s32 1, %v1988_v32 }
 0x200   : > { %1058 = vrot.lane.b32.xlu0 %v1052_v29, %s2652_s23 }
 0x201   : > { %vm377_vm0 = vcmp.le.s32.totalorder %v2381_v59, 15 }
 0x203   : > { %694 = vrot.lane.b32.xlu1 %v691_v61, %s2650_s15 }
 0x204   : > { %1097 = vrot.lane.b32.xlu0 %v1091_v53, %s2653_s25 }
 0x207   : > { %846 = vrot.lane.b32.xlu1 %v840_v10, %s2651_s16 }
 0x208   : > { %1169 = vrot.lane.b32.xlu0 %v1163_v0, %s2654_s26 }
 0x20b   : > { %1056 = vrot.lane.b32.xlu1 %v1053_v2, %s2652_s23 }
 0x20c   : > { %1240 = vrot.lane.b32.xlu0 %v1234_v58, %s1838_s10 }
 0x20f   : > { %1095 = vrot.lane.b32.xlu1 %v1092_v14, %s2653_s25 }
 0x210   : > { %994 = vrot.lane.b32.xlu0 %v988_v34, %s2655_s8 }
 0x211   : > { %v2302_v63 = vpop.permute.xlu1 %506 }
 0x212   : > { %v2304_v38 = vpop.permute.xlu0 %431 }
 0x213   : > { %1167 = vrot.lane.b32.xlu1 %v1164_v36, %s2654_s26 }
 0x214   : > { %1136 = vrot.lane.b32.xlu0 %v1130_v9, %s1840_s11 }
 0x215   : > { %v2313_v18 = vpop.permute.xlu1 %621 }
 0x216   : > { %v2315_v42 = vpop.permute.xlu0 %582 }
 0x217   : > { %1238 = vrot.lane.b32.xlu1 %v1235_v49, %s1838_s10  ;;  %s1843_s10 = smov 60  }
 0x218   : > { %1205 = vrot.lane.b32.xlu0 %v1203_v47, %s1839_s7  ;;  %v2416_v47 = vadd.s32 2, %v1988_v32 }
 0x219   : > { %v2327_v35 = vpop.permute.xlu1 %725 }
 0x21a   : > { %v2329_v50 = vpop.permute.xlu0 %473  ;;  %vm385_vm7 = vcmp.le.s32.totalorder %v2416_v47, 15 }
 0x21b   : > { %992 = vrot.lane.b32.xlu1 %v989_v16, %s2655_s8 }
 0x21c   : > { %661 = vrot.lane.b32.xlu0 %v659_v19, %s1841_s12 }
 0x21d   : > { %v2339_v17 = vpop.permute.xlu1 %803 }
 0x21e   : > { %v2341_v6 = vpop.permute.xlu0 %549 }
 0x21f   : > { %1134 = vrot.lane.b32.xlu1 %v1131_v11, %s1840_s11  ;;  %s1844_s11 = smov 16  }
 0x220   : > { %1025 = vrot.lane.b32.xlu0 %v1022_v40, %s1837_s9 }
 0x221   : > { %v2349_v21 = vpop.permute.xlu1 %912 }
 0x222   : > { %v2351_v22 = vpop.permute.xlu0 %764 }
 0x223   : > { %475 = vrot.lane.b32.xlu1 %v470_v45, %s1824_s17  ;;  %v2434_v45 = vadd.s32 2, %v2068_v55  ;;  %s1845_s17 = smov 113  }
 0x224   : > { %1209 = vrot.lane.b32.xlu0 %v1204_v24, %s1839_s7 }
 0x225   : > { %v2356_v20 = vpop.permute.xlu1 %692  ;;  %vm386_vm8 = vcmp.le.s32.totalorder %v2434_v45, 15 }
 0x226   : > { %v2358_v44 = vpop.permute.xlu0 %873 }
 0x227   : > { %1023 = vrot.lane.b32.xlu1 %v1014_v5, %s1837_s9 }
 0x228   : > { %1277 = vrot.lane.b32.xlu0 %v1274_v57, %s1843_s10 }
 0x229   : > { %v2361_v26 = vpop.permute.xlu1 %1054 }
 0x22a   : > { %v2363_v43 = vpop.permute.xlu0 %951 }
 0x22b   : > { %1275 = vrot.lane.b32.xlu1 %v1266_v25, %s1843_s10 }
 0x22c   : > { %1403 = vrot.lane.b32.xlu0 %v1968_v1, %s1844_s11  ;;  %v2384_v1 = vadd.s32 4294967295, %v1988_v32 }
 0x22d   : > { %v2367_v27 = vpop.permute.xlu1 %1165 }
 0x22e   : > { %v2369_v54 = vpop.permute.xlu0 %842  ;;  %vm367_vm1 = vcmp.ge.s32.totalorder %v2384_v1, 0 }
 0x22f   : > { %1279 = vrot.lane.b32.xlu1 %v1273_v62, %s1843_s10 }
 0x231   : > { %v2372_v28 = vpop.permute.xlu1 %990 }
 0x232   : > { %v2374_v48 = vpop.permute.xlu0 %1093 }
 0x235   : > { %v2376_v56 = vpop.permute.xlu1 %1027 }
 0x236   : > { %v2378_v29 = vpop.permute.xlu0 %1236 }
 0x239   : > { %v2386_v31 = vpop.permute.xlu1 %1207 }
 0x23a   : > { %v2388_v53 = vpop.permute.xlu0 %1132 }
 0x23d   : > { %v434_v8 = vpop.permute.xlu1 %433 }
 0x23e   : > { %v509_v61 = vpop.permute.xlu0 %508  ;;  %v438_v0 = vsel %vm437_vm15, %v2304_v38, %v434_v8 }
 0x23f   : > { %v513_v33 = vsel %vm512_vm14, %v2302_v63, %v509_v61  ;;  %v442_v30 = vsel %vm367_vm1, %v438_v0, 0.0 }
 0x240   : > { %v517_v10 = vsel %vm377_vm0, %v513_v33, 0.0  ;;  %v446_v2 = vrot.slane %v442_v30, 6 }
 0x241   : > { %v521_v58 = vrot.slane %v517_v10, 2  ;;  %v436_v14 = vpop.permute.xlu1 %435 }
 0x242   : > { %v585_v34 = vpop.permute.xlu0 %584  ;;  %450 = vst [vmem:[#allocation3] sm:$0xc] %v446_v2  ;;  %v439_v63 = vsel %vm437_vm15, %v434_v8, %v436_v14  ;;  %vm770_vm15 = vcmask 785408  }
 0x243   : > { %525 = vst [vmem:[#allocation3] sm:$0xc0] %v521_v58  ;;  %v589_v39 = vsel %vm588_vm2, %v2315_v42, %v585_v34  ;;  %v443_v9 = vsel %vm368_vm3, %v439_v63, 0.0 }
 0x244   : > { %v593_v38 = vsel %vm359_vm10, %v589_v39, 0.0  ;;  %v447_v12 = vrot.slane %v443_v9, 6 }
 0x245   : > { %v597_v36 = vrot.slane %v593_v38, 6  ;;  %v511_v7 = vpop.permute.xlu1 %510 }
 0x246   : > { %v624_v49 = vpop.permute.xlu0 %623  ;;  %451 = vst [vmem:[#allocation3 + $0x8] sm:$0xc] %v447_v12  ;;  %v514_v13 = vsel %vm512_vm14, %v509_v61, %v511_v7  ;;  %vm731_vm14 = vcmask 883712  }
 0x247   : > { %601 = vst [vmem:[#allocation3 + $0x10] sm:$0xc] %v597_v36  ;;  %v628_v42 = vsel %vm627_vm4, %v2313_v18, %v624_v49  ;;  %v518_v16 = vsel %vm378_vm5, %v514_v13, 0.0 }
 0x248   : > { %v632_v19 = vsel %vm367_vm1, %v628_v42, 0.0  ;;  %v522_v41 = vrot.slane %v518_v16, 2 }
 0x249   : > { %v636_v5 = vrot.slane %v632_v19, 4  ;;  %v587_v11 = vpop.permute.xlu1 %586 }
 0x24a   : > { %v552_v40 = vpop.permute.xlu0 %551  ;;  %526 = vst [vmem:[#allocation3 + $0x8] sm:$0xc0] %v522_v41  ;;  %v590_v46 = vsel %vm588_vm2, %v585_v34, %v587_v11  ;;  %vm809_vm2 = vcmask 777216  }
 0x24b   : > { %640 = vst [vmem:[#allocation3 + $0x10] sm:$0x30] %v636_v5  ;;  %v556_v18 = vsel %vm555_vm6, %v2341_v6, %v552_v40  ;;  %v594_v52 = vsel %vm360_vm11, %v590_v46, 0.0 }
 0x24c   : > { %v560_v15 = vsel %vm385_vm7, %v556_v18, 0.0  ;;  %v598_v24 = vrot.slane %v594_v52, 6 }
 0x24d   : > { %562 = vst [vmem:[#allocation3 + $0x10] sm:$0x3] %v560_v15  ;;  %v626_v57 = vpop.permute.xlu1 %625 }
 0x24e   : > { %v666_v25 = vpop.permute.xlu0 %665  ;;  %602 = vst [vmem:[#allocation3 + $0x18] sm:$0xc] %v598_v24  ;;  %v629_v51 = vsel %vm627_vm4, %v624_v49, %v626_v57 }
 0x24f   : > { %v633_v6 = vsel %vm368_vm3, %v629_v51, 0.0 }
 0x250   : > { %v637_v62 = vrot.slane %v633_v6, 4 }
 0x251   : > { %v554_v8 = vpop.permute.xlu1 %553 }
 0x252   : > { %v730_v61 = vpop.permute.xlu0 %729  ;;  %641 = vst [vmem:[#allocation3 + $0x18] sm:$0x30] %v637_v62  ;;  %v557_v33 = vsel %vm555_vm6, %v552_v40, %v554_v8  ;;  %vm879_vm6 = vcmask 760832  }
 0x253   : > { %v561_v0 = vsel %vm386_vm8, %v557_v33, 0.0 }
 0x254   : > { %563 = vst [vmem:[#allocation3 + $0x18] sm:$0x3] %v561_v0 }
 0x255   : > { %v2443_v30 = vpop.permute.xlu1 %663 }
 0x256   : > { %v769_v10 = vpop.permute.xlu0 %768  ;;  %v669_v58 = vsel %vm667_vm9, %v2443_v30, %v666_v25 }
 0x257   : > { %673 = vst [vmem:[#allocation3 + $0x18] sm:$0xc0] %v669_v58 }
 0x259   : > { %v472_v34 = vpop.permute.xlu1 %471 }
 0x25a   : > { %v808_v2 = vpop.permute.xlu0 %807  ;;  %v478_v14 = vsel %vm477_vm13, %v472_v34, %v2329_v50 }
 0x25b   : > { %482 = vst [vmem:[#allocation3] sm:$0x30] %v478_v14 }
 0x25d   : > { %v728_v63 = vpop.permute.xlu1 %727 }
 0x25e   : > { %v878_v39 = vpop.permute.xlu0 %877  ;;  %v732_v38 = vsel %vm731_vm14, %v2327_v35, %v728_v63  ;;  %v733_v9 = vsel %vm731_vm14, %v728_v63, %v730_v61  ;;  %vm848_vm14 = vcmask 769024  }
 0x25f   : > { %v736_v36 = vsel %vm385_vm7, %v732_v38, 0.0  ;;  %v737_v12 = vsel %vm386_vm8, %v733_v9, 0.0 }
 0x260   : > { %v740_v49 = vrot.slane %v736_v36, 6  ;;  %v741_v7 = vrot.slane %v737_v12, 6 }
 0x261   : > { %v767_v13 = vpop.permute.xlu1 %766 }
 0x262   : > { %v917_v42 = vpop.permute.xlu0 %916  ;;  %744 = vst [vmem:[#allocation3 + $0x20] sm:$0xc] %v740_v49  ;;  %745 = vst [vmem:[#allocation3 + $0x28] sm:$0xc] %v741_v7  ;;  %v771_v19 = vsel %vm770_vm15, %v2351_v22, %v767_v13  ;;  %v772_v16 = vsel %vm770_vm15, %v767_v13, %v769_v10 }
 0x263   : > { %v775_v35 = vsel %vm359_vm10, %v771_v19, 0.0  ;;  %v776_v5 = vsel %vm360_vm11, %v772_v16, 0.0 }
 0x264   : > { %v779_v41 = vrot.slane %v775_v35, 4  ;;  %v780_v40 = vrot.slane %v776_v5, 4 }
 0x265   : > { %v806_v18 = vpop.permute.xlu1 %805 }
 0x266   : > { %v956_v11 = vpop.permute.xlu0 %955  ;;  %783 = vst [vmem:[#allocation3 + $0x20] sm:$0x30] %v779_v41  ;;  %784 = vst [vmem:[#allocation3 + $0x28] sm:$0x30] %v780_v40  ;;  %v810_v46 = vsel %vm809_vm2, %v2339_v17, %v806_v18  ;;  %v811_v15 = vsel %vm809_vm2, %v806_v18, %v808_v2  ;;  %vm918_vm2 = vcmask 752640  }
 0x267   : > { %v814_v22 = vsel %vm367_vm1, %v810_v46, 0.0  ;;  %v815_v52 = vsel %vm368_vm3, %v811_v15, 0.0 }
 0x268   : > { %v818_v24 = vrot.slane %v814_v22, 2  ;;  %v819_v25 = vrot.slane %v815_v52, 2 }
 0x269   : > { %v876_v51 = vpop.permute.xlu1 %875 }
 0x26a   : > { %v697_v57 = vpop.permute.xlu0 %696  ;;  %822 = vst [vmem:[#allocation3 + $0x20] sm:$0xc0] %v818_v24  ;;  %823 = vst [vmem:[#allocation3 + $0x28] sm:$0xc0] %v819_v25  ;;  %v880_v6 = vsel %vm879_vm6, %v2358_v44, %v876_v51  ;;  %v881_v62 = vsel %vm879_vm6, %v876_v51, %v878_v39  ;;  %vm957_vm6 = vcmask 654336  }
 0x26b   : > { %v884_v17 = vsel %vm377_vm0, %v880_v6, 0.0  ;;  %v885_v61 = vsel %vm378_vm5, %v881_v62, 0.0 }
 0x26c   : > { %v888_v8 = vrot.slane %v884_v17, 6  ;;  %v889_v33 = vrot.slane %v885_v61, 6 }
 0x26d   : > { %v915_v10 = vpop.permute.xlu1 %914 }
 0x26e   : > { %v845_v0 = vpop.permute.xlu0 %844  ;;  %892 = vst [vmem:[#allocation3 + $0x30] sm:$0xc] %v888_v8  ;;  %893 = vst [vmem:[#allocation3 + $0x38] sm:$0xc] %v889_v33  ;;  %v919_v44 = vsel %vm918_vm2, %v2349_v21, %v915_v10  ;;  %v920_v2 = vsel %vm918_vm2, %v915_v10, %v917_v42  ;;  %vm698_vm2 = vcmask 891904  }
 0x26f   : > { %v849_v58 = vsel %vm848_vm14, %v2369_v54, %v845_v0  ;;  %v923_v34 = vsel %vm385_vm7, %v919_v44, 0.0  ;;  %v924_v14 = vsel %vm386_vm8, %v920_v2, 0.0 }
 0x270   : > { %853 = vst [vmem:[#allocation3 + $0x30] sm:$0x3] %v849_v58  ;;  %v927_v39 = vrot.slane %v923_v34, 4  ;;  %v928_v63 = vrot.slane %v924_v14, 4 }
 0x271   : > { %v954_v9 = vpop.permute.xlu1 %953 }
 0x272   : > { %v1059_v38 = vpop.permute.xlu0 %1058  ;;  %931 = vst [vmem:[#allocation3 + $0x30] sm:$0x30] %v927_v39  ;;  %932 = vst [vmem:[#allocation3 + $0x38] sm:$0x30] %v928_v63  ;;  %v958_v36 = vsel %vm957_vm6, %v2363_v43, %v954_v9  ;;  %v959_v54 = vsel %vm957_vm6, %v954_v9, %v956_v11  ;;  %vm1060_vm6 = vcmask 629760  }
 0x273   : > { %v962_v21 = vsel %vm359_vm10, %v958_v36, 0.0  ;;  %v963_v12 = vsel %vm360_vm11, %v959_v54, 0.0 }
 0x274   : > { %v966_v49 = vrot.slane %v962_v21, 2  ;;  %v967_v7 = vrot.slane %v963_v12, 2 }
 0x275   : > { %v695_v13 = vpop.permute.xlu1 %694 }
 0x276   : > { %v1098_v42 = vpop.permute.xlu0 %1097  ;;  %970 = vst [vmem:[#allocation3 + $0x30] sm:$0xc0] %v966_v49  ;;  %971 = vst [vmem:[#allocation3 + $0x38] sm:$0xc0] %v967_v7  ;;  %v699_v19 = vsel %vm698_vm2, %v2356_v20, %v695_v13  ;;  %v700_v16 = vsel %vm698_vm2, %v695_v13, %v697_v57  ;;  %vm1099_vm2 = vcmask 621568  }
 0x277   : > { %v703_v43 = vsel %vm377_vm0, %v699_v19, 0.0  ;;  %v704_v35 = vsel %vm378_vm5, %v700_v16, 0.0 }
 0x278   : > { %705 = vst [vmem:[#allocation3 + $0x20] sm:$0x3] %v703_v43  ;;  %706 = vst [vmem:[#allocation3 + $0x28] sm:$0x3] %v704_v35 }
 0x279   : > { %v847_v41 = vpop.permute.xlu1 %846 }
 0x27a   : > { %v1170_v5 = vpop.permute.xlu0 %1169  ;;  %v850_v40 = vsel %vm848_vm14, %v845_v0, %v847_v41  ;;  %vm1171_vm14 = vcmask 515072  }
 0x27b   : > { %854 = vst [vmem:[#allocation3 + $0x38] sm:$0x3] %v850_v40 }
 0x27d   : > { %v1057_v18 = vpop.permute.xlu1 %1056 }
 0x27e   : > { %v1241_v11 = vpop.permute.xlu0 %1240  ;;  %v1061_v46 = vsel %vm1060_vm6, %v2361_v26, %v1057_v18  ;;  %v1062_v20 = vsel %vm1060_vm6, %v1057_v18, %v1059_v38  ;;  %vm1211_vm6 = vcmask 506880  }
 0x27f   : > { %v1065_v15 = vsel %vm377_vm0, %v1061_v46, 0.0  ;;  %v1066_v22 = vsel %vm378_vm5, %v1062_v20, 0.0  ;;  %v1295_v46 = vld [vmem:[#allocation3 + $0x18] sm:$0xff] }
 0x280   : > { %v1069_v52 = vrot.slane %v1065_v15, 4  ;;  %v1070_v24 = vrot.slane %v1066_v22, 4 }
 0x281   : > { %v1096_v57 = vpop.permute.xlu1 %1095 }
 0x282   : > { %v995_v25 = vpop.permute.xlu0 %994  ;;  %1073 = vst [vmem:[#allocation3 + $0x40] sm:$0x30] %v1069_v52  ;;  %1074 = vst [vmem:[#allocation3 + $0x48] sm:$0x30] %v1070_v24  ;;  %v1100_v51 = vsel %vm1099_vm2, %v2374_v48, %v1096_v57  ;;  %v1101_v6 = vsel %vm1099_vm2, %v1096_v57, %v1098_v42  ;;  %vm1242_vm2 = vcmask 498688   ;;  %v1299_v20 = vld [vmem:[#allocation3 + $0x38] sm:$0xff] }
 0x283   : > { %v1104_v26 = vsel %vm385_vm7, %v1100_v51, 0.0  ;;  %v1105_v62 = vsel %vm386_vm8, %v1101_v6, 0.0  ;;  %v1292_v52 = vld [vmem:[#allocation3] sm:$0xff]  ;;  %v1297_v57 = vld [vmem:[#allocation3 + $0x28] sm:$0xff] }
 0x284   : > { %v1108_v17 = vrot.slane %v1104_v26, 2  ;;  %v1109_v61 = vrot.slane %v1105_v62, 2  ;;  %v1309_v6 = vpack.c.bf16 %v1299_v20, %v1297_v57  ;;  %v1296_v26 = vld [vmem:[#allocation3 + $0x20] sm:$0xff] }
 0x285   : > { %v1168_v33 = vpop.permute.xlu1 %1167 }
 0x286   : > { %v1137_v8 = vpop.permute.xlu0 %1136  ;;  %1112 = vst [vmem:[#allocation3 + $0x40] sm:$0xc0] %v1108_v17  ;;  %1113 = vst [vmem:[#allocation3 + $0x48] sm:$0xc0] %v1109_v61  ;;  %v1172_v0 = vsel %vm1171_vm14, %v2367_v27, %v1168_v33  ;;  %v1173_v10 = vsel %vm1171_vm14, %v1168_v33, %v1170_v5  ;;  %vm996_vm14 = vcmask 646144   ;;  %v1298_v61 = vld [vmem:[#allocation3 + $0x30] sm:$0xff] }
 0x287   : > { %v1176_v48 = vsel %vm367_vm1, %v1172_v0, 0.0  ;;  %v1177_v58 = vsel %vm368_vm3, %v1173_v10, 0.0 }
 0x288   : > { %v1180_v44 = vrot.slane %v1176_v48, 6  ;;  %v1181_v2 = vrot.slane %v1177_v58, 6 }
 0x289   : > { %v1239_v14 = vpop.permute.xlu1 %1238 }
 0x28a   : > { %v1206_v34 = vpop.permute.xlu0 %1205  ;;  %1184 = vst [vmem:[#allocation3 + $0x50] sm:$0xc] %v1180_v44  ;;  %1185 = vst [vmem:[#allocation3 + $0x58] sm:$0xc] %v1181_v2  ;;  %v1243_v27 = vsel %vm1242_vm2, %v2378_v29, %v1239_v14  ;;  %v1244_v63 = vsel %vm1242_vm2, %v1239_v14, %v1241_v11  ;;  %vm1416_vm2 = vcmp.ge.s32.totalorder %v2068_v55, 1 }
 0x28b   : > { %v1212_v39 = vsel %vm1211_vm6, %v1206_v34, %v2386_v31  ;;  %v1247_v38 = vsel %vm377_vm0, %v1243_v27, 0.0  ;;  %v1248_v9 = vsel %vm378_vm5, %v1244_v63, 0.0  ;;  %vm1029_vm0 = vcmask 637952  }
 0x28c   : > { %1216 = vst [vmem:[#allocation3 + $0x50] sm:$0x30] %v1212_v39  ;;  %v1251_v36 = vrot.slane %v1247_v38, 2  ;;  %v1252_v54 = vrot.slane %v1248_v9, 2  ;;  %vm1138_vm5 = vcmask 523264   ;;  %v1314_v9 = vld [vmem:[%s2623_s4] sm:$0xff] }
 0x28d   : > { %v993_v12 = vpop.permute.xlu1 %992  ;;  %v1716_v38 = vld [vmem:[%s2622_s3] sm:$0x3f]  }
 0x28e   : > { %v662_v21 = vpop.permute.xlu0 %661  ;;  %1255 = vst [vmem:[#allocation3 + $0x50] sm:$0xc0] %v1251_v36  ;;  %1256 = vst [vmem:[#allocation3 + $0x58] sm:$0xc0] %v1252_v54  ;;  %v997_v29 = vsel %vm996_vm14, %v2372_v28, %v993_v12  ;;  %v998_v7 = vsel %vm996_vm14, %v993_v12, %v995_v25  ;;  %vm1439_vm14 = vcmp.le.s32.totalorder %v1988_v32, 14 }
 0x28f   : > { %v668_v49 = vsel %vm667_vm9, %v662_v21, %v2443_v30  ;;  %v1001_v59 = vsel %vm367_vm1, %v997_v29, 0.0  ;;  %v1002_v4 = vsel %vm368_vm3, %v998_v7, 0.0  ;;  %vm1411_vm1 = vcmask 1047556  }
 0x290   : > { %672 = vst [vmem:[#allocation3 + $0x10] sm:$0xc0] %v668_v49  ;;  %1003 = vst [vmem:[#allocation3 + $0x40] sm:$0x3] %v1001_v59  ;;  %vm1406_vm3 = vcmask 130048  }
 0x291   : > { %1004 = vst [vmem:[#allocation3 + $0x48] sm:$0x3] %v1002_v4  ;;  %v1135_v13 = vpop.permute.xlu1 %1134 }
 0x292   : > { %v1026_v42 = vpop.permute.xlu0 %1025  ;;  %v1139_v30 = vsel %vm1138_vm5, %v2388_v53, %v1135_v13  ;;  %v1140_v28 = vsel %vm1138_vm5, %v1135_v13, %v1137_v8  ;;  %v1308_v8 = vpack.c.bf16 %v1298_v61, %v1296_v26 }
 0x293   : > { %v1031_v19 = vsel %vm1029_vm0, %v1026_v42, %v2376_v56  ;;  %v1143_v1 = vsel %vm359_vm10, %v1139_v30, 0.0  ;;  %v1144_v23 = vsel %vm360_vm11, %v1140_v28, 0.0  ;;  %vm1410_vm10 = vcmask 1043584   ;;  %v1717_v30 = vld [vmem:[%s1965_s30] sm:$0xff]  ;;  %s228_s30 = sand.u32 1, %s1804_s19  }
 0x294   : > { %1035 = vst [vmem:[#allocation3 + $0x48] sm:$0xc] %v1031_v19  ;;  %1145 = vst [vmem:[#allocation3 + $0x50] sm:$0x3] %v1143_v1  ;;  %vm1281_vm11 = vcmask 490496   ;;  %s1591_s16 = sshll.u32 %s228_s30, 3 }
 0x295   : > { %1146 = vst [vmem:[#allocation3 + $0x58] sm:$0x3] %v1144_v23  ;;  %v476_v43 = vpop.permute.xlu1 %475  ;;  %vm2530_vm9 = vmor %vm1411_vm1, %vm1410_vm10  ;;  %s230_s23 = scalar_lea.vmem [#allocation8], %s1591_s16 }
 0x296   : > { %v1210_v16 = vpop.permute.xlu0 %1209  ;;  %v479_v56 = vsel %vm477_vm13, %v2329_v50, %v476_v43  ;;  %vm1432_vm13 = vcmask 924672   ;;  %s1514_s25 = sshll.u32 %s230_s23, 4  ;;  %s2579_s25 = int_to_ptr.vmem [resolvable:$true] %s1514_s25 }
 0x297   : > { %v1213_v35 = vsel %vm1211_vm6, %v2386_v31, %v1210_v16  ;;  %483 = vst [vmem:[#allocation3 + $0x8] sm:$0x30] %v479_v56  ;;  %v1294_v40 = vld [vmem:[#allocation3 + $0x10] sm:$0xff]  ;;  %vm1415_vm6 = vcmp.ge.s32.totalorder %v1988_v32, 1  ;;  %v1315_v32 = vld [vmem:[%s2623_s4 + $0x8] sm:$0xf] }
 0x298   : > { %1217 = vst [vmem:[#allocation3 + $0x58] sm:$0x30] %v1213_v35  ;;  %v1306_v25 = vpack.c.bf16 %v1294_v40, %v1292_v52 }
 0x299   : > { %v1024_v5 = vpop.permute.xlu1 %1023 }
 0x29a   : > { %v1278_v53 = vpop.permute.xlu0 %1277  ;;  %v1030_v37 = vsel %vm1029_vm0, %v1024_v5, %v1026_v42  ;;  %vm1440_vm0 = vcmp.le.s32.totalorder %v2068_v55, 14 }
 0x29b   : > { %1034 = vst [vmem:[#allocation3 + $0x40] sm:$0xc] %v1030_v37  ;;  %v1301_v33 = vld [vmem:[#allocation3 + $0x48] sm:$0xff]  ;;  %v1302_v48 = vld [vmem:[#allocation3 + $0x50] sm:$0xff] }
 0x29d   : > { %v1276_v31 = vpop.permute.xlu1 %1275 }
 0x29e   : > { %v1404_v41 = vpop.permute.xlu0 %1403  ;;  %v1282_v50 = vsel %vm1281_vm11, %v1276_v31, %v1278_v53  ;;  %v1293_v18 = vld [vmem:[#allocation3 + $0x8] sm:$0xff] }
 0x29f   : > { %v1405_v11 = vrot.slane %v1404_v41, 4  ;;  %v1286_v15 = vsel %vm385_vm7, %v1282_v50, 0.0  ;;  %v1307_v22 = vpack.c.bf16 %v1295_v46, %v1293_v18  ;;  %v1303_v47 = vld [vmem:[#allocation3 + $0x58] sm:$0xff]  ;;  %vm1335_vm7 = vcmask 1040384  }
 0x2a0   : > { %1288 = vst [vmem:[#allocation3 + $0x60] sm:$0x3] %v1286_v15  ;;  %v1311_v0 = vpack.c.bf16 %v1303_v47, %v1301_v33 }
 0x2a1   : > { %v1407_v24 = vsel %vm1406_vm3, %v1405_v11, %v1404_v41  ;;  %1414 = vst.msk [vmem:[#allocation4 + $0x8] sm:$0xf] %vm1399_vm12, %v1405_v11  ;;  %v1280_v51 = vpop.permute.xlu1 %1279  ;;  %1342 = vmatprep.subr.bf16.mxu1 %v1307_v22 }
 0x2a2   : > { %1413 = vst.msk [vmem:[#allocation4] sm:$0xff] %vm2530_vm9, %v1407_v24  ;;  %v1283_v62 = vsel %vm1281_vm11, %v1278_v53, %v1280_v51  ;;  %1343 = vmatpush1.bf16.msra.mxu1 %v1306_v25  ;;  %v1300_v10 = vld [vmem:[#allocation3 + $0x40] sm:$0xff] }
 0x2a3   : > { %v1287_v17 = vsel %vm386_vm8, %v1283_v62, 0.0  ;;  %1344 = vmatprep.subr.bf16.mxu1 %v1309_v6  ;;  %v1310_v2 = vpack.c.bf16 %v1302_v48, %v1300_v10  ;;  %vm1331_vm8 = vcmask 408576  }
 0x2a4   : > { %1289 = vst [vmem:[#allocation3 + $0x68] sm:$0x3] %v1287_v17 }
 0x2a6   : > { %1345 = vmatpush1.bf16.msra.mxu1 %v1308_v8 }
 0x2a7   : > { %1346 = vmatprep.subr.bf16.mxu1 %v1311_v0  ;;  %v1304_v58 = vld [vmem:[#allocation3 + $0x60] sm:$0x3] }
 0x2a8   : > { %v1312_v14 = vpack.c.bf16 %v1304_v58, %v1304_v58  ;;  %v1418_v39 = vld [vmem:[#allocation4 + $0x8] sm:$0xf] }
 0x2a9   : > { %v1417_v44 = vld [vmem:[#allocation4] sm:$0xff] }
 0x2aa   : > { %1426 = vrot.lane.b32.xlu1 %v1417_v44, %s1845_s17  ;;  %v1425_v34 = vcombine.high %v1417_v44, %v1417_v44  ;;  %1347 = vmatpush1.bf16.msra.mxu1 %v1310_v2  ;;  %v1337_v63 = vsel %vm1335_vm7, %v1312_v14, 0 }
 0x2ab   : > { %v1305_v45 = vld [vmem:[#allocation3 + $0x68] sm:$0x3] }
 0x2ac   : > { %1428 = vrot.lane.b32.xlu0 %v1425_v34, %s1845_s17  ;;  %v1313_v27 = vpack.c.bf16 %v1305_v45, %v1305_v45 }
 0x2ae   : > { %1430 = vrot.lane.b32.xlu1 %v1418_v39, %s1845_s17  ;;  %1598 = vmatprep.subr.msk.bf16.mxu1 %vm1335_vm7, %v1313_v27  ;;  %s1746_s17 = scalar_lea.vmem %s2579_s25, 128 }
 0x2af   : > { %1349 = vmatpush1.bf16.msra.mxu1 %v1337_v63  ;;  %p1747_p5 = scmp.ne.s32.totalorder %s2579_s25, %s1746_s17 }
 0x2b0   : > { %1445 = vrot.lane.b32.xlu0 %v1417_v44, %s1821_s14 }
 0x2b1   : > { %p1748_p10 = pnand %p1747_p5, %p2658_p9 }
 0x2b2   : > { %1447 = vrot.lane.b32.xlu1 %v1425_v34, %s1821_s14  ;;  %1599 = vmatmul.mubr.msk.bf16.vlgmr.msra.gmra.mrb[0].mxu1 %vm1331_vm8, %v1716_v38 }
 0x2b3   : > { %p1749_p12 = pneg %p1748_p10 }
 0x2b4   : > { %1449 = vrot.lane.b32.xlu0 %v1418_v39, %s1821_s14 }
 0x2b8   : > { %1318 = vperm.xlu0 %1688, %v1314_v9  }
 0x31c   : > { %v1427_v36 = vpop.permute.xlu1 %1426 }
 0x31e   : > { %v1429_v54 = vpop.permute.xlu0 %1428 }
 0x31f   : > { %v1433_v12 = vsel %vm1432_vm13, %v1427_v36, %v1429_v54 }
 0x320   : > { %v1431_v21 = vpop.permute.xlu1 %1430  ;;  %v1437_v7 = vsel %vm1415_vm6, %v1433_v12, -inf }
 0x321   : > { %v1434_v49 = vsel %vm1432_vm13, %v1429_v54, %v1431_v21  ;;  %v1457_v28 = vmax.f32 %v1437_v7, %v1717_v30 }
 0x322   : > { %v1446_v29 = vpop.permute.xlu0 %1445  ;;  %v1438_v59 = vsel %vm1416_vm2, %v1434_v49, -inf }
 0x323   : > { %v1458_v1 = vmax.f32 %v1438_v59, %v1975_v3 }
 0x324   : > { %v1448_v4 = vpop.permute.xlu1 %1447 }
 0x325   : > { %v1451_v42 = vsel %vm627_vm4, %v1446_v29, %v1448_v4 }
 0x326   : > { %v1455_v13 = vsel %vm1439_vm14, %v1451_v42, -inf  ;;  %v1450_v19 = vpop.permute.xlu0 %1449 }
 0x327   : > { %v1452_v23 = vsel %vm627_vm4, %v1448_v4, %v1450_v19  ;;  %v1459_v43 = vmax.f32 %v1457_v28, %v1455_v13 }
 0x328   : > { %v1456_v16 = vsel %vm1440_vm0, %v1452_v23, -inf }
 0x329   : > { %v1460_v35 = vmax.f32 %v1458_v1, %v1456_v16 }
 0x32b   : > { %v1463_v56 = vcombine.low %v1459_v43, %v1460_v35 }
 0x32d   : > { %1464 = vrot.lane.b32.xlu1 %v1463_v56, %s1844_s11  ;;  %s1500_s11 = scalar_lea.sflag [#allocation7], %s228_s30 }
 0x331   : > { %1323 = vperm.xlu1 %1689, %v1315_v32  }
 0x337   : > { %v1319_v40 = vpop.permute.xlu0 %1318 }
 0x385   : > { %v1376_v55 = vpop.f32.mrb[0].mxu1 }
 0x386   : > { %v1378_v53 = vpop.f32.mrb[1].mxu1  ;;  %v1377_v11 = vadd.f32 %v1376_v55, %v1319_v40 }
 0x387   : > { %v1380_v5 = vpop.f32.mrb[2].mxu1  ;;  %v1379_v50 = vadd.f32 %v1378_v53, %v1319_v40 }
 0x388   : > { %v1382_v37 = vpop.f32.mrb[3].mxu1  ;;  %v1385_v20 = vmax.f32 %v1377_v11, 0.0 }
 0x389   : > { %v1386_v15 = vmax.f32 %v1379_v50, 0.0 }
 0x38a   : > { %v1391_v22 = vrot.slane %v1385_v20, 4 }
 0x38b   : > { %v1392_v52 = vrot.slane %v1386_v15, 4 }
 0x38c   : > { %v1395_v51 = vadd.f32 %v1391_v22, %v1385_v20 }
 0x38d   : > { %v1396_v60 = vadd.f32 %v1392_v52, %v1386_v15 }
 0x39f   : > { %v1465_v41 = vpop.permute.xlu1 %1464 }
 0x3a0   : > { %v1466_v31 = vrot.slane %v1465_v41, 4 }
 0x3a2   : > { %v1467_v3 = vsel %vm1406_vm3, %v1466_v31, %v1465_v41  ;;  %1471 = vst.msk [vmem:[#allocation4 + $0x8] sm:$0xf] %vm1399_vm12, %v1466_v31  ;;  %vm1484_vm12 = vcmask 1043456  }
 0x3a3   : > { %1470 = vst.msk [vmem:[#allocation4] sm:$0xff] %vm2530_vm9, %v1467_v3 }
 0x3a9   : > { %v1475_v18 = vld [vmem:[#allocation4 + $0x8] sm:$0xf] }
 0x3aa   : > { %1480 = vrot.lane.b32.xlu1 %v1475_v18, %s1828_s6  ;;  %v1472_v46 = vld [vmem:[#allocation4] sm:$0xff] }
 0x3ab   : > { %1478 = vrot.lane.b32.xlu0 %v1472_v46, %s1828_s6  ;;  %v1474_v0 = vmax.f32 %v1472_v46, %v1463_v56  ;;  %s1606_s6 = sshll.u32 %s1898_s22, 7  ;;  %s1846_s22 = smov [#allocation8]  }
 0x3ac   : > { %s2577_s10 = scalar_lea.hbm %s2624_s5, %s1606_s6  ;;  %s1750_s7 = sshll.u32 %s1846_s22, 4  ;;  %s1751_s7 = int_to_ptr.vmem [resolvable:$false] %s1750_s7 }
 0x3ad   : > { %s1752_s9 = scalar_lea.vmem %s1751_s7, 256  ;;  %p1753_p2 = scmp.lt.s32.totalorder %s2579_s25, %s1751_s7 }
 0x3ae   : > { %p1754_p3 = scmp.lt.s32.totalorder %s1752_s9, %s1746_s17 }
 0x3b0   : > { %v1324_v24 = vpop.permute.xlu1 %1323  ;;  %p1755_p4 = por %p1754_p3, %p1753_p2 }
 0x3b1   : > { %v1381_v25 = vadd.f32 %v1380_v5, %v1324_v24  ;;  %v1383_v57 = vadd.f32 %v1382_v37, %v1324_v24 }
 0x3b2   : > { %p1756_p7 = pnand %p1755_p4, %p1749_p12 }
 0x3b3   : > { %v1387_v6 = vmax.f32 %v1381_v25, 0.0  ;;  %v1388_v26 = vmax.f32 %v1383_v57, 0.0 }
 0x3b5   : > { %v1397_v62 = vadd.f32 %v1395_v51, %v1387_v6  ;;  %v1398_v47 = vadd.f32 %v1396_v60, %v1388_v26 }
 0x41c   : > { %v1481_v17 = vpop.permute.xlu1 %1480 }
 0x41d   : > { %v1483_v61 = vrot.slane %v1481_v17, 4  ;;  %v1479_v8 = vpop.permute.xlu0 %1478 }
 0x41e   : > { %v1482_v33 = vrot.slane %v1479_v8, 4 }
 0x420   : > { %v1485_v10 = vsel %vm1484_vm12, %v1482_v33, %v1483_v61 }
 0x421   : > { %v1486_v48 = vsel %vm770_vm15, %v1479_v8, %v1485_v10 }
 0x422   : > { %v1488_v58 = vmax.f32 %v1474_v0, %v1486_v48 }
 0x424   : > { %v1490_v44 = vcombine.high %v1488_v58, %v1488_v58  ;;  %v1492_v2 = vadd.f32 %v1488_v58, %v1397_v62 }
 0x426   : > { %v1493_v34 = vadd.f32 %v1490_v44, %v1398_v47 }
 0x428   : > { %v1496_v14 = vcombine.low %v1492_v2, %v1493_v34 }
 0x42a   : > { %1498 = vst [vmem:[%s230_s23] sm:$0xff] %v1496_v14 }
 0x42b   : > { %1759 = shalt.err (!%p1756_p7)
}
 0x42c   : > { %s1760_s12 = scalar_lea.hbm %s2577_s10, 128  ;;  %s1764_s15 = scalar_lea.hbm %s2624_s5, 256 }
 0x42d   : > { %p1761_p8 = scmp.ne.s32.totalorder %s2577_s10, %s1760_s12  ;;  %p1765_p1 = scmp.lt.u32.totalorder %s2577_s10, %s2624_s5 }
 0x42e   : > { %p1766_p0 = scmp.lt.u32.totalorder %s1764_s15, %s1760_s12  ;;  %p1768_p5 = scmp.lt.u32.totalorder %s1760_s12, %s2577_s10 }
 0x42f   : > { %p1762_p11 = pnand %p1761_p8, %p2658_p9 }
 0x430   : > { %p1767_p6 = por %p1766_p0, %p1765_p1 }
 0x431   : > { %p1763_p13 = pneg %p1762_p11 }
 0x432   : > { %p1769_p10 = por %p1768_p5, %p1767_p6 }
 0x434   : > { %p1770_p12 = pnand %p1769_p10, %p1763_p13 }
 0x436   : > { %1773 = shalt.err (!%p1770_p12)
}
 0x437   : > { %1611 = dma.vmem_to_hbm [thread:$0]  (%p2658_p9), %s2579_s25, 128, %s2577_s10, %s1500_s11  }
 0x438 PF: > { %p1623_p2 = scmp.ge.s32.totalorder %s1812_s21, 2  ;;  %s1526_s6 = sand.u32 1, %s1800_s18  }
 0x439   : > { %p2659_p3 = scmp.ne.s32.totalorder %s2643_s29, 0  ;;  %s1527_s23 = scalar_lea.sflag [#allocation7], %s1526_s6 }
 0x43b   : > { %p1618_p4 = pnand %p1623_p2, %p2659_p3 }
 0x43d   : > { %1795 = dma.done.wait (!%p1618_p4), %s1527_s23, 128  }
 0x43e   : > { %1797 = vsyncadd (!%p1618_p4), %s1527_s23, 4294967168  ;;  %p16_p7 = scmp.ge.s32.totalorder %s1902_s24, 4   ;;  %s2660_s18 = smov %s1804_s19 }
 0x43f   : > { %s2661_s19 = smov %s1808_s20  ;;  %s2662_s20 = smov %s1913_s27 }
 0x440   : > { %s2663_s21 = smov %s1902_s24  ;;  %18 = sbr.rel (!%p16_p7) target bundleno = 4 (0x4), region = 80 }
 0x447   :  { %1532 = vsyncpa [#allocation6], 1 }
 0x448   :  { %1534 = vsyncpa [#allocation6 + $0x1], 1 }
 0x449   :  { %1535 = vsyncpa [#allocation7], 1 }
 0x44a   :  { %1537 = vsyncpa [#allocation7 + $0x1], 1 }

</bundles_post_ra>
